<compile_context>
chip_gen: v7x
topology: tpu7x:2x2x1
jax: 0.10.0
libtpu: 0.0.40
codegen_flags: <defaults>
</compile_context>

<pallas_src>
import jax
import jax.numpy as jnp
from jax.experimental import pallas as pl
from jax.experimental.pallas import tpu as pltpu


def _dwconv3x3_kernel(x_ref, w_ref, o_ref, xpad_ref):
    # x_ref   : (H, W, Cb)      unpadded input block (channels-last)
    # w_ref   : (3, 3, Cb)      per-channel taps
    # o_ref   : (H, W, Cb)      output block
    # xpad_ref: (H+2, W+2, Cb)  VMEM scratch, zero border
    H, W, Cb = o_ref.shape

    # Zero the scratch every grid step (scratch is uninitialized and, with the
    # channel axis marked "parallel", different cores may own different steps).
    # Border stays zero; interior is overwritten with this channel block.
    xpad_ref[...] = jnp.zeros((H + 2, W + 2, Cb), jnp.float32)
    xpad_ref[1:1 + H, 1:1 + W, :] = x_ref[...].astype(jnp.float32)

    # 9 shifted multiply-accumulates, reading ref slices directly (pure VPU).
    acc = None
    for dh in range(3):
        for dw in range(3):
            tap = w_ref[dh, dw, :][None, None, :]                  # (1, 1, Cb)
            contrib = xpad_ref[dh:dh + H, dw:dw + W, :] * tap      # (H, W, Cb)
            acc = contrib if acc is None else acc + contrib
    o_ref[...] = acc.astype(o_ref.dtype)


def depthwise_conv3x3(x_nchw, weight_oi33, *, cb=384):
    """x_nchw: (N, C, H, W) f32; weight_oi33: (C, 1, 3, 3) f32 (PyTorch layout)."""
    N, C, H, W = x_nchw.shape
    c_pad = pl.cdiv(C, cb) * cb          # 1824 -> 1920 (15 * 128), lane-dense
    n_blocks = c_pad // cb               # 5 grid steps for cb=384

    # (3, 3, C) channels-last taps, padded on the lane axis.
    w_hwc = jnp.transpose(weight_oi33[:, 0, :, :], (1, 2, 0))
    w_hwc = jnp.pad(w_hwc, ((0, 0), (0, 0), (0, c_pad - C)))

    call = pl.pallas_call(
        _dwconv3x3_kernel,
        out_shape=jax.ShapeDtypeStruct((H, W, c_pad), jnp.float32),
        grid=(n_blocks,),
        in_specs=[
            pl.BlockSpec((H, W, cb), lambda c: (0, 0, c)),
            pl.BlockSpec((3, 3, cb), lambda c: (0, 0, c)),
        ],
        out_specs=pl.BlockSpec((H, W, cb), lambda c: (0, 0, c)),
        scratch_shapes=[pltpu.VMEM((H + 2, W + 2, cb), jnp.float32)],
        compiler_params=pltpu.CompilerParams(
            dimension_semantics=("parallel",)),  # shard channel blocks on v7x
    )

    outs = []
    for n in range(N):  # N == 1 for this module; tiny glue loop in JAX
        # TODO(synk): if the surrounding model kept activations channels-last,
        # these NCHW<->HWC transposes would disappear entirely.
        x_hwc = jnp.transpose(x_nchw[n], (1, 2, 0))                  # (H, W, C)
        x_hwc = jnp.pad(x_hwc, ((0, 0), (0, 0), (0, c_pad - C)))     # lane pad only
        y_hwc = call(x_hwc, w_hwc)                                   # (H, W, c_pad)
        outs.append(jnp.transpose(y_hwc[:, :, :C], (2, 0, 1)))       # (C, H, W)
    return jnp.stack(outs, axis=0)                                   # (N, C, H, W)


if __name__ == "__main__":
    # Shapes implied by the module: input (1, 1824, 7, 7), dw 3x3 weight (1824, 1, 3, 3)
    N, C, H, W = 1, 1824, 7, 7
    key = jax.random.PRNGKey(0)
    kx, kw = jax.random.split(key)
    x = jax.random.normal(kx, (N, C, H, W), dtype=jnp.float32)
    weight = jax.random.normal(kw, (C, 1, 3, 3), dtype=jnp.float32) * 0.1

    fwd = jax.jit(depthwise_conv3x3)
    y = fwd(x, weight)
    y = jax.block_until_ready(y)

    # Sanity check against XLA's depthwise conv (reference only).
    y_ref = jax.lax.conv_general_dilated(
        x, weight, window_strides=(1, 1), padding=((1, 1), (1, 1)),
        dimension_numbers=("NCHW", "OIHW", "NCHW"), feature_group_count=C,
    )
    assert y.shape == (N, C, H, W)
    assert jnp.max(jnp.abs(y - y_ref)) < 1e-4

    print("KERNEL_OK")
</pallas_src>

<mosaic_0001>
module attributes {stable_mosaic.version = 11 : i64} {
  func.func @_dwconv3x3_kernel(%arg0: i32, %arg1: memref<7x7x384xf32, #tpu.memory_space<vmem>>, %arg2: memref<3x3x384xf32, #tpu.memory_space<vmem>>, %arg3: memref<7x7x384xf32, #tpu.memory_space<vmem>>, %arg4: memref<9x9x384xf32, #tpu.memory_space<vmem>>) attributes {dimension_semantics = [#tpu.dimension_semantics<parallel>], iteration_bounds = array<i64: 5>, scalar_prefetch = 0 : i64, scratch_operands = 1 : i64, tpu.core_type = #tpu.core_type<tc>, window_params = [{transform_indices = @transform_0, window_bounds = array<i64: 7, 7, 384>}, {transform_indices = @transform_1, window_bounds = array<i64: 3, 3, 384>}, {transform_indices = @transform_2, window_bounds = array<i64: 7, 7, 384>}]} {
    %cst = arith.constant 0.000000e+00 : f32
    %0 = vector.broadcast %cst : f32 to vector<9x9x384xf32>
    %c0 = arith.constant 0 : index
    %c0_0 = arith.constant 0 : index
    %c0_1 = arith.constant 0 : index
    %1 = vector.load %arg4[%c0, %c0_0, %c0_1] : memref<9x9x384xf32, #tpu.memory_space<vmem>>, vector<9x9x384xf32>
    tpu.vector_store %arg4[%c0, %c0_0, %c0_1], %0 {strides = array<i32>} : memref<9x9x384xf32, #tpu.memory_space<vmem>>, vector<9x9x384xf32>,
    %c0_2 = arith.constant 0 : index
    %c0_3 = arith.constant 0 : index
    %c0_4 = arith.constant 0 : index
    %2 = vector.load %arg1[%c0_2, %c0_3, %c0_4] : memref<7x7x384xf32, #tpu.memory_space<vmem>>, vector<7x7x384xf32>
    %c1 = arith.constant 1 : index
    %c1_5 = arith.constant 1 : index
    %c0_6 = arith.constant 0 : index
    %3 = vector.load %arg4[%c1, %c1_5, %c0_6] : memref<9x9x384xf32, #tpu.memory_space<vmem>>, vector<7x7x384xf32>
    tpu.vector_store %arg4[%c1, %c1_5, %c0_6], %2 {strides = array<i32>} : memref<9x9x384xf32, #tpu.memory_space<vmem>>, vector<7x7x384xf32>,
    %c0_7 = arith.constant 0 : index
    %c0_8 = arith.constant 0 : index
    %c0_9 = arith.constant 0 : index
    %4 = vector.load %arg2[%c0_7, %c0_8, %c0_9] : memref<3x3x384xf32, #tpu.memory_space<vmem>>, vector<1x1x384xf32>
    %5 = vector.shape_cast %4 : vector<1x1x384xf32> to vector<384xf32>
    %6 = vector.shape_cast %5 : vector<384xf32> to vector<1x1x384xf32>
    %c0_10 = arith.constant 0 : index
    %c0_11 = arith.constant 0 : index
    %c0_12 = arith.constant 0 : index
    %7 = vector.load %arg4[%c0_10, %c0_11, %c0_12] : memref<9x9x384xf32, #tpu.memory_space<vmem>>, vector<7x7x384xf32>
    %8 = vector.broadcast %6 : vector<1x1x384xf32> to vector<7x7x384xf32>
    %9 = arith.mulf %7, %8 : vector<7x7x384xf32>
    %c0_13 = arith.constant 0 : index
    %c1_14 = arith.constant 1 : index
    %c0_15 = arith.constant 0 : index
    %10 = vector.load %arg2[%c0_13, %c1_14, %c0_15] : memref<3x3x384xf32, #tpu.memory_space<vmem>>, vector<1x1x384xf32>
    %11 = vector.shape_cast %10 : vector<1x1x384xf32> to vector<384xf32>
    %12 = vector.shape_cast %11 : vector<384xf32> to vector<1x1x384xf32>
    %c0_16 = arith.constant 0 : index
    %c1_17 = arith.constant 1 : index
    %c0_18 = arith.constant 0 : index
    %13 = vector.load %arg4[%c0_16, %c1_17, %c0_18] : memref<9x9x384xf32, #tpu.memory_space<vmem>>, vector<7x7x384xf32>
    %14 = vector.broadcast %12 : vector<1x1x384xf32> to vector<7x7x384xf32>
    %15 = arith.mulf %13, %14 : vector<7x7x384xf32>
    %16 = arith.addf %9, %15 : vector<7x7x384xf32>
    %c0_19 = arith.constant 0 : index
    %c2 = arith.constant 2 : index
    %c0_20 = arith.constant 0 : index
    %17 = vector.load %arg2[%c0_19, %c2, %c0_20] : memref<3x3x384xf32, #tpu.memory_space<vmem>>, vector<1x1x384xf32>
    %18 = vector.shape_cast %17 : vector<1x1x384xf32> to vector<384xf32>
    %19 = vector.shape_cast %18 : vector<384xf32> to vector<1x1x384xf32>
    %c0_21 = arith.constant 0 : index
    %c2_22 = arith.constant 2 : index
    %c0_23 = arith.constant 0 : index
    %20 = vector.load %arg4[%c0_21, %c2_22, %c0_23] : memref<9x9x384xf32, #tpu.memory_space<vmem>>, vector<7x7x384xf32>
    %21 = vector.broadcast %19 : vector<1x1x384xf32> to vector<7x7x384xf32>
    %22 = arith.mulf %20, %21 : vector<7x7x384xf32>
    %23 = arith.addf %16, %22 : vector<7x7x384xf32>
    %c1_24 = arith.constant 1 : index
    %c0_25 = arith.constant 0 : index
    %c0_26 = arith.constant 0 : index
    %24 = vector.load %arg2[%c1_24, %c0_25, %c0_26] : memref<3x3x384xf32, #tpu.memory_space<vmem>>, vector<1x1x384xf32>
    %25 = vector.shape_cast %24 : vector<1x1x384xf32> to vector<384xf32>
    %26 = vector.shape_cast %25 : vector<384xf32> to vector<1x1x384xf32>
    %c1_27 = arith.constant 1 : index
    %c0_28 = arith.constant 0 : index
    %c0_29 = arith.constant 0 : index
    %27 = vector.load %arg4[%c1_27, %c0_28, %c0_29] : memref<9x9x384xf32, #tpu.memory_space<vmem>>, vector<7x7x384xf32>
    %28 = vector.broadcast %26 : vector<1x1x384xf32> to vector<7x7x384xf32>
    %29 = arith.mulf %27, %28 : vector<7x7x384xf32>
    %30 = arith.addf %23, %29 : vector<7x7x384xf32>
    %c1_30 = arith.constant 1 : index
    %c1_31 = arith.constant 1 : index
    %c0_32 = arith.constant 0 : index
    %31 = vector.load %arg2[%c1_30, %c1_31, %c0_32] : memref<3x3x384xf32, #tpu.memory_space<vmem>>, vector<1x1x384xf32>
    %32 = vector.shape_cast %31 : vector<1x1x384xf32> to vector<384xf32>
    %33 = vector.shape_cast %32 : vector<384xf32> to vector<1x1x384xf32>
    %c1_33 = arith.constant 1 : index
    %c1_34 = arith.constant 1 : index
    %c0_35 = arith.constant 0 : index
    %34 = vector.load %arg4[%c1_33, %c1_34, %c0_35] : memref<9x9x384xf32, #tpu.memory_space<vmem>>, vector<7x7x384xf32>
    %35 = vector.broadcast %33 : vector<1x1x384xf32> to vector<7x7x384xf32>
    %36 = arith.mulf %34, %35 : vector<7x7x384xf32>
    %37 = arith.addf %30, %36 : vector<7x7x384xf32>
    %c1_36 = arith.constant 1 : index
    %c2_37 = arith.constant 2 : index
    %c0_38 = arith.constant 0 : index
    %38 = vector.load %arg2[%c1_36, %c2_37, %c0_38] : memref<3x3x384xf32, #tpu.memory_space<vmem>>, vector<1x1x384xf32>
    %39 = vector.shape_cast %38 : vector<1x1x384xf32> to vector<384xf32>
    %40 = vector.shape_cast %39 : vector<384xf32> to vector<1x1x384xf32>
    %c1_39 = arith.constant 1 : index
    %c2_40 = arith.constant 2 : index
    %c0_41 = arith.constant 0 : index
    %41 = vector.load %arg4[%c1_39, %c2_40, %c0_41] : memref<9x9x384xf32, #tpu.memory_space<vmem>>, vector<7x7x384xf32>
    %42 = vector.broadcast %40 : vector<1x1x384xf32> to vector<7x7x384xf32>
    %43 = arith.mulf %41, %42 : vector<7x7x384xf32>
    %44 = arith.addf %37, %43 : vector<7x7x384xf32>
    %c2_42 = arith.constant 2 : index
    %c0_43 = arith.constant 0 : index
    %c0_44 = arith.constant 0 : index
    %45 = vector.load %arg2[%c2_42, %c0_43, %c0_44] : memref<3x3x384xf32, #tpu.memory_space<vmem>>, vector<1x1x384xf32>
    %46 = vector.shape_cast %45 : vector<1x1x384xf32> to vector<384xf32>
    %47 = vector.shape_cast %46 : vector<384xf32> to vector<1x1x384xf32>
    %c2_45 = arith.constant 2 : index
    %c0_46 = arith.constant 0 : index
    %c0_47 = arith.constant 0 : index
    %48 = vector.load %arg4[%c2_45, %c0_46, %c0_47] : memref<9x9x384xf32, #tpu.memory_space<vmem>>, vector<7x7x384xf32>
    %49 = vector.broadcast %47 : vector<1x1x384xf32> to vector<7x7x384xf32>
    %50 = arith.mulf %48, %49 : vector<7x7x384xf32>
    %51 = arith.addf %44, %50 : vector<7x7x384xf32>
    %c2_48 = arith.constant 2 : index
    %c1_49 = arith.constant 1 : index
    %c0_50 = arith.constant 0 : index
    %52 = vector.load %arg2[%c2_48, %c1_49, %c0_50] : memref<3x3x384xf32, #tpu.memory_space<vmem>>, vector<1x1x384xf32>
    %53 = vector.shape_cast %52 : vector<1x1x384xf32> to vector<384xf32>
    %54 = vector.shape_cast %53 : vector<384xf32> to vector<1x1x384xf32>
    %c2_51 = arith.constant 2 : index
    %c1_52 = arith.constant 1 : index
    %c0_53 = arith.constant 0 : index
    %55 = vector.load %arg4[%c2_51, %c1_52, %c0_53] : memref<9x9x384xf32, #tpu.memory_space<vmem>>, vector<7x7x384xf32>
    %56 = vector.broadcast %54 : vector<1x1x384xf32> to vector<7x7x384xf32>
    %57 = arith.mulf %55, %56 : vector<7x7x384xf32>
    %58 = arith.addf %51, %57 : vector<7x7x384xf32>
    %c2_54 = arith.constant 2 : index
    %c2_55 = arith.constant 2 : index
    %c0_56 = arith.constant 0 : index
    %59 = vector.load %arg2[%c2_54, %c2_55, %c0_56] : memref<3x3x384xf32, #tpu.memory_space<vmem>>, vector<1x1x384xf32>
    %60 = vector.shape_cast %59 : vector<1x1x384xf32> to vector<384xf32>
    %61 = vector.shape_cast %60 : vector<384xf32> to vector<1x1x384xf32>
    %c2_57 = arith.constant 2 : index
    %c2_58 = arith.constant 2 : index
    %c0_59 = arith.constant 0 : index
    %62 = vector.load %arg4[%c2_57, %c2_58, %c0_59] : memref<9x9x384xf32, #tpu.memory_space<vmem>>, vector<7x7x384xf32>
    %63 = vector.broadcast %61 : vector<1x1x384xf32> to vector<7x7x384xf32>
    %64 = arith.mulf %62, %63 : vector<7x7x384xf32>
    %65 = arith.addf %58, %64 : vector<7x7x384xf32>
    %c0_60 = arith.constant 0 : index
    %c0_61 = arith.constant 0 : index
    %c0_62 = arith.constant 0 : index
    %66 = vector.load %arg3[%c0_60, %c0_61, %c0_62] : memref<7x7x384xf32, #tpu.memory_space<vmem>>, vector<7x7x384xf32>
    tpu.vector_store %arg3[%c0_60, %c0_61, %c0_62], %65 {strides = array<i32>} : memref<7x7x384xf32, #tpu.memory_space<vmem>>, vector<7x7x384xf32>,
    return
  }
  func.func @transform_0(%arg0: i32) -> (i32, i32, i32) {
    %c0_i32 = arith.constant 0 : i32
    %c0_i32_0 = arith.constant 0 : i32
    %c0_i32_1 = arith.constant 0 : i32
    return %c0_i32, %c0_i32_0, %arg0 : i32, i32, i32
  }
  func.func @transform_1(%arg0: i32) -> (i32, i32, i32) {
    %c0_i32 = arith.constant 0 : i32
    %c0_i32_0 = arith.constant 0 : i32
    %c0_i32_1 = arith.constant 0 : i32
    return %c0_i32, %c0_i32_0, %arg0 : i32, i32, i32
  }
  func.func @transform_2(%arg0: i32) -> (i32, i32, i32) {
    %c0_i32 = arith.constant 0 : i32
    %c0_i32_0 = arith.constant 0 : i32
    %c0_i32_1 = arith.constant 0 : i32
    return %c0_i32, %c0_i32_0, %arg0 : i32, i32, i32
  }
}

</mosaic_0001>

<bundles_post_ra>
// kernel: depthwise_conv3x3.1
= control target key start
LH: loop header
LB: loop body
LE: loop exit
PB: predicated region body
PF: predicated region fallthrough
CT: control target
= control target key end

     0   :  { %s2088_s9 = smov 0   ;;  %s2090_s10 = smov 0   ;;  %s2749_s0 = inlined_call_operand.vmem [shape: f32[7,7,1920], index: 0, kind: input, shape index: {}]   ;;  %s2750_s1 = inlined_call_operand.vmem [shape: f32[3,3,1920], index: 1, kind: input, shape index: {}]   ;;  %s2751_s2 = inlined_call_operand.vmem [shape: f32[7,7,1920], index: 2, kind: output, shape index: {}]  }
   0x1   :  { %s2092_s11 = smov 0  }
   0x2 LB: > { %s1992_s12 = sadd.s32 4294967295, %s2070_s11   ;;  %s2105_s13 = sadd.s32 1, %s2070_s11   ;;  %s2070_s11 = sphi %s2092_s11, %s2756_s11   ;;  %s2066_s10 = sphi %s2090_s10, %s2755_s10   ;;  %s2062_s9 = sphi %s2088_s9, %s2754_s9  }
   0x3   : > { %s16_s14 = ssub.s32 %s2070_s11, %s2105_s13  ;;  %s19_s15 = sadd.s32 1, %s2066_s10 }
   0x4   : > { %p17_p0 = scmp.eq.s32.totalorder %s16_s14, 0  ;;  %p26_p1 = scmp.ne.s32.totalorder %s2066_s10, %s2062_s9 }
   0x5   : > { %p27_p2 = scmp.eq.s32.totalorder %s2070_s11, 0  ;;  %p82_p3 = scmp.eq.s32.totalorder %s1992_s12, 4 }
   0x6   : > { %s2116_s16 = scalar_select %p17_p0, %s2066_s10, %s19_s15  }
   0x7   : > { %p2118_p4 = por %p27_p2, %p26_p1  ;;  %p2122_p5 = por %p82_p3, %p26_p1 }
   0x8   : > { %p1995_p6 = scmp.ge.s32.totalorder %s2070_s11, 5 }
   0xa   : > { %104 = sbr.rel (%p1995_p6) target bundleno = 41 (0x29), region = 16 }
  0x11   : > { %107 = sbr.rel (!%p2118_p4) target bundleno = 33 (0x21), region = 20  ;;  %s109_s19 = sand.u32 (%p2118_p4), 1, %s2066_s10  }
  0x12   : > { %s2016_s20 = smul.u32 (%p2118_p4), 24, %s2070_s11 }
  0x13   : > { %s2019_s21 = smul.u32 (%p2118_p4), 168, %s109_s19 }
  0x14   : > { %s2134_s24 = scalar_lea.vmem (%p2118_p4), %s2749_s0, %s2016_s20 }
  0x15   : > { %v127_v0 = vld [vmem:[%s2134_s24] sm:$0xff] (%p2118_p4)  ;;  %v129_v1 = vld [vmem:[%s2134_s24 + $0x8] sm:$0xff] (%p2118_p4)  ;;  %v131_v2 = vld [vmem:[%s2134_s24 + $0x10] sm:$0xff] (%p2118_p4)  ;;  %s2139_s25 = scalar_lea.vmem (%p2118_p4), [#allocation3], %s2019_s21 }
  0x16   : > { %128 = vst [vmem:[%s2139_s25] sm:$0xff] (%p2118_p4), %v127_v0  ;;  %130 = vst [vmem:[%s2139_s25 + $0x8] sm:$0xff] (%p2118_p4), %v129_v1  ;;  %v133_v3 = vld [vmem:[%s2134_s24 + $0x78] sm:$0xff] (%p2118_p4)  ;;  %v135_v4 = vld [vmem:[%s2134_s24 + $0x80] sm:$0xff] (%p2118_p4) }
  0x17   : > { %132 = vst [vmem:[%s2139_s25 + $0x10] sm:$0xff] (%p2118_p4), %v131_v2  ;;  %v137_v5 = vld [vmem:[%s2134_s24 + $0x88] sm:$0xff] (%p2118_p4)  ;;  %134 = vst [vmem:[%s2139_s25 + $0x18] sm:$0xff] (%p2118_p4), %v133_v3  ;;  %v139_v6 = vld [vmem:[%s2134_s24 + $0xf0] sm:$0xff] (%p2118_p4) }
  0x18   : > { %136 = vst [vmem:[%s2139_s25 + $0x20] sm:$0xff] %v135_v4  ;;  %138 = vst [vmem:[%s2139_s25 + $0x28] sm:$0xff] %v137_v5  ;;  %v141_v7 = vld [vmem:[%s2134_s24 + $0xf8] sm:$0xff]  ;;  %v143_v8 = vld [vmem:[%s2134_s24 + $0x100] sm:$0xff] }
  0x19   : > { %140 = vst [vmem:[%s2139_s25 + $0x30] sm:$0xff] %v139_v6  ;;  %142 = vst [vmem:[%s2139_s25 + $0x38] sm:$0xff] %v141_v7  ;;  %v145_v9 = vld [vmem:[%s2134_s24 + $0x168] sm:$0xff]  ;;  %v147_v10 = vld [vmem:[%s2134_s24 + $0x170] sm:$0xff] }
  0x1a   : > { %144 = vst [vmem:[%s2139_s25 + $0x40] sm:$0xff] %v143_v8  ;;  %v149_v11 = vld [vmem:[%s2134_s24 + $0x178] sm:$0xff]  ;;  %146 = vst [vmem:[%s2139_s25 + $0x48] sm:$0xff] %v145_v9  ;;  %v151_v12 = vld [vmem:[%s2134_s24 + $0x1e0] sm:$0xff] }
  0x1b   : > { %148 = vst [vmem:[%s2139_s25 + $0x50] sm:$0xff] %v147_v10  ;;  %150 = vst [vmem:[%s2139_s25 + $0x58] sm:$0xff] %v149_v11  ;;  %v153_v13 = vld [vmem:[%s2134_s24 + $0x1e8] sm:$0xff]  ;;  %v155_v14 = vld [vmem:[%s2134_s24 + $0x1f0] sm:$0xff] }
  0x1c   : > { %152 = vst [vmem:[%s2139_s25 + $0x60] sm:$0xff] %v151_v12  ;;  %154 = vst [vmem:[%s2139_s25 + $0x68] sm:$0xff] %v153_v13  ;;  %v157_v15 = vld [vmem:[%s2134_s24 + $0x258] sm:$0xff]  ;;  %v159_v16 = vld [vmem:[%s2134_s24 + $0x260] sm:$0xff] }
  0x1d   : > { %156 = vst [vmem:[%s2139_s25 + $0x70] sm:$0xff] %v155_v14  ;;  %v161_v17 = vld [vmem:[%s2134_s24 + $0x268] sm:$0xff]  ;;  %158 = vst [vmem:[%s2139_s25 + $0x78] sm:$0xff] %v157_v15  ;;  %v163_v18 = vld [vmem:[%s2134_s24 + $0x2d0] sm:$0xff] }
  0x1e   : > { %160 = vst [vmem:[%s2139_s25 + $0x80] sm:$0xff] %v159_v16  ;;  %162 = vst [vmem:[%s2139_s25 + $0x88] sm:$0xff] %v161_v17  ;;  %v165_v19 = vld [vmem:[%s2134_s24 + $0x2d8] sm:$0xff]  ;;  %v167_v20 = vld [vmem:[%s2134_s24 + $0x2e0] sm:$0xff] }
  0x1f   : > { %164 = vst [vmem:[%s2139_s25 + $0x90] sm:$0xff] %v163_v18  ;;  %166 = vst [vmem:[%s2139_s25 + $0x98] sm:$0xff] %v165_v19 }
  0x20   : > { %168 = vst [vmem:[%s2139_s25 + $0xa0] sm:$0xff] %v167_v20 }
  0x21 PF: > { %174 = sbr.rel (!%p2118_p4) target bundleno = 41 (0x29), region = 43  ;;  %s176_s26 = sand.u32 (%p2118_p4), 1, %s2066_s10  }
  0x22   : > { %s2017_s27 = smul.u32 (%p2118_p4), 12, %s2070_s11 }
  0x23   : > { %s2020_s28 = smul.u32 (%p2118_p4), 36, %s176_s26 }
  0x24   : > { %s181_s3 = scalar_lea.vmem (%p2118_p4), %s2750_s1, %s2017_s27 }
  0x25   : > { %v196_v21 = vld [vmem:[%s181_s3] sm:$0xff] (%p2118_p4)  ;;  %v200_v23 = vld [vmem:[%s181_s3 + $0x78] sm:$0xff] (%p2118_p4)  ;;  %s178_s4 = scalar_lea.vmem (%p2118_p4), [#allocation4], %s2020_s28  ;;  %v1998_v24 = vld [vmem:[%s181_s3 + $0x8] sm:$0xf] (%p2118_p4) }
  0x26   : > { %v198_v22 = vld [vmem:[%s181_s3 + $0x3c] sm:$0xff] (%p2118_p4)  ;;  %197 = vst [vmem:[%s178_s4] sm:$0xff] (%p2118_p4), %v196_v21  ;;  %201 = vst [vmem:[%s178_s4 + $0x18] sm:$0xff] (%p2118_p4), %v200_v23  ;;  %v2000_v25 = vld [vmem:[%s181_s3 + $0x44] sm:$0xf] (%p2118_p4) }
  0x27   : > { %199 = vst [vmem:[%s178_s4 + $0xc] sm:$0xff] (%p2118_p4), %v198_v22  ;;  %v2002_v26 = vld [vmem:[%s181_s3 + $0x80] sm:$0xf] (%p2118_p4)  ;;  %1999 = vst [vmem:[%s178_s4 + $0x8] sm:$0xf] (%p2118_p4), %v1998_v24 }
  0x28   : > { %2001 = vst [vmem:[%s178_s4 + $0x14] sm:$0xf] %v2000_v25  ;;  %2003 = vst [vmem:[%s178_s4 + $0x20] sm:$0xf] %v2002_v26 }
  0x29 PF: > { %p2004_p7 = scmp.ge.s32.totalorder %s2070_s11, 1  ;;  %p219_p8 = scmp.lt.s32.totalorder %s2070_s11, 6 }
  0x2b   : > { %p220_p9 = pnand %p2004_p7, %p219_p8 }
  0x2c   : > { %s226_s5 = sand.u32 (!%p220_p9), 1, %s2062_s9   ;;  %v443_v27 = vlaneseq (!%p220_p9)  ;;  %v2072_v28 = vmov (!%p220_p9), 0.0   ;;  %vm767_vm0 = vcmask (!%p220_p9), 1045504  }
  0x2d   : > { %223 = sbr.rel (%p220_p9) target bundleno = 277 (0x115), region = 69  ;;  %260 = vst [vmem:[#allocation2] sm:$0xff] (!%p220_p9), %v2072_v28  ;;  %261 = vst [vmem:[#allocation2 + $0x8] sm:$0xff] (!%p220_p9), %v2072_v28 }
  0x2e   : > { %262 = vst [vmem:[#allocation2 + $0x10] sm:$0xff] (!%p220_p9), %v2072_v28  ;;  %263 = vst [vmem:[#allocation2 + $0x18] sm:$0x1] (!%p220_p9), %v2072_v28  ;;  %s2192_s6 = smul.u32 (!%p220_p9), 168, %s226_s5  ;;  %v2198_v29 = vshrl.u32 (!%p220_p9), %v443_v27, 7 }
  0x2f   : > { %264 = vst [vmem:[#allocation2 + $0x20] sm:$0x1] (!%p220_p9), %v2072_v28  ;;  %265 = vst [vmem:[#allocation2 + $0x28] sm:$0x1] (!%p220_p9), %v2072_v28  ;;  %s2196_s7 = smul.u32 (!%p220_p9), 36, %s226_s5 }
  0x30   : > { %266 = vst [vmem:[#allocation2 + $0x30] sm:$0xff] (!%p220_p9), %v2072_v28  ;;  %267 = vst [vmem:[#allocation2 + $0x38] sm:$0xff] (!%p220_p9), %v2072_v28  ;;  %s2201_s8 = scalar_lea.vmem (!%p220_p9), [#allocation3], %s2192_s6  ;;  %v2210_v40 = vsub.s32 (!%p220_p9), 0, %v2198_v29  ;;  %s2361_s14 = scalar_lea.vmem (!%p220_p9), [#allocation5], %s2192_s6 }
  0x31   : > { %268 = vst [vmem:[#allocation2 + $0x40] sm:$0xff] (!%p220_p9), %v2072_v28  ;;  %269 = vst [vmem:[#allocation2 + $0x48] sm:$0x1] (!%p220_p9), %v2072_v28  ;;  %v314_v30 = vld [vmem:[%s2201_s8] sm:$0x7f] (!%p220_p9)  ;;  %s2228_s9 = scalar_lea.vmem (!%p220_p9), [#allocation4], %s2196_s7 }
  0x32   : > { %270 = vst [vmem:[#allocation2 + $0x50] sm:$0x1] (!%p220_p9), %v2072_v28  ;;  %271 = vst [vmem:[#allocation2 + $0x58] sm:$0x1] (!%p220_p9), %v2072_v28  ;;  %v315_v31 = vld [vmem:[%s2201_s8 + $0x8] sm:$0x7f] (!%p220_p9) }
  0x33   : > { %272 = vst [vmem:[#allocation2 + $0x60] sm:$0xff] (!%p220_p9), %v2072_v28  ;;  %273 = vst [vmem:[#allocation2 + $0x68] sm:$0xff] (!%p220_p9), %v2072_v28  ;;  %v316_v32 = vld [vmem:[%s2201_s8 + $0x10] sm:$0x7f] (!%p220_p9)  ;;  %v356_v33 = vrot.slane (!%p220_p9), %v314_v30, 7  ;;  %v357_v34 = vrot.slane (!%p220_p9), %v315_v31, 7 }
  0x34   : > { %274 = vst [vmem:[#allocation2 + $0x70] sm:$0xff] %v2072_v28  ;;  %275 = vst [vmem:[#allocation2 + $0x78] sm:$0x1] %v2072_v28  ;;  %v358_v35 = vrot.slane %v316_v32, 7  ;;  %v317_v36 = vld [vmem:[%s2201_s8 + $0x18] sm:$0x7f] }
  0x35   : > { %276 = vst [vmem:[#allocation2 + $0x80] sm:$0x1] %v2072_v28  ;;  %277 = vst [vmem:[#allocation2 + $0x88] sm:$0x1] %v2072_v28  ;;  %v359_v37 = vrot.slane %v317_v36, 7  ;;  %s2018_s15 = smul.u32 (%p2122_p5), 24, %s1992_s12 }
  0x36   : > { %278 = vst [vmem:[#allocation2 + $0x90] sm:$0xff] %v2072_v28  ;;  %279 = vst [vmem:[#allocation2 + $0x98] sm:$0xff] %v2072_v28  ;;  %v318_v38 = vld [vmem:[%s2201_s8 + $0x20] sm:$0x7f]  ;;  %v319_v39 = vld [vmem:[%s2201_s8 + $0x28] sm:$0x7f] }
  0x37   : > { %280 = vst [vmem:[#allocation2 + $0xa0] sm:$0xff] %v2072_v28  ;;  %281 = vst [vmem:[#allocation2 + $0xa8] sm:$0x1] %v2072_v28  ;;  %v360_v41 = vrot.slane %v318_v38, 7  ;;  %v361_v42 = vrot.slane %v319_v39, 7  ;;  %s2701_s18 = scalar_lea.vmem (%p2122_p5), %s2751_s2, %s2018_s15 }
  0x38   : > { %282 = vst [vmem:[#allocation2 + $0xb0] sm:$0x1] %v2072_v28  ;;  %283 = vst [vmem:[#allocation2 + $0xb8] sm:$0x1] %v2072_v28  ;;  %v320_v43 = vld [vmem:[%s2201_s8 + $0x30] sm:$0x7f] }
  0x39   : > { %284 = vst [vmem:[#allocation2 + $0xc0] sm:$0xff] %v2072_v28  ;;  %285 = vst [vmem:[#allocation2 + $0xc8] sm:$0xff] %v2072_v28  ;;  %v321_v44 = vld [vmem:[%s2201_s8 + $0x38] sm:$0x7f]  ;;  %v362_v45 = vrot.slane %v320_v43, 7 }
  0x3a   : > { %286 = vst [vmem:[#allocation2 + $0xd0] sm:$0xff] %v2072_v28  ;;  %287 = vst [vmem:[#allocation2 + $0xd8] sm:$0x1] %v2072_v28  ;;  %v363_v46 = vrot.slane %v321_v44, 7  ;;  %v322_v47 = vld [vmem:[%s2201_s8 + $0x40] sm:$0x7f] }
  0x3b   : > { %288 = vst [vmem:[#allocation2 + $0xe0] sm:$0x1] %v2072_v28  ;;  %289 = vst [vmem:[#allocation2 + $0xe8] sm:$0x1] %v2072_v28  ;;  %v323_v48 = vld [vmem:[%s2201_s8 + $0x48] sm:$0x7f] }
  0x3c   : > { %290 = vst [vmem:[#allocation2 + $0xf0] sm:$0xff] %v2072_v28  ;;  %291 = vst [vmem:[#allocation2 + $0xf8] sm:$0xff] %v2072_v28  ;;  %v364_v49 = vrot.slane %v322_v47, 7  ;;  %v365_v50 = vrot.slane %v323_v48, 7  ;;  %v324_v51 = vld [vmem:[%s2201_s8 + $0x50] sm:$0x7f] }
  0x3d   : > { %292 = vst [vmem:[#allocation2 + $0x100] sm:$0xff] %v2072_v28  ;;  %293 = vst [vmem:[#allocation2 + $0x108] sm:$0x1] %v2072_v28  ;;  %v325_v52 = vld [vmem:[%s2201_s8 + $0x58] sm:$0x7f]  ;;  %v366_v53 = vrot.slane %v324_v51, 7 }
  0x3e   : > { %294 = vst [vmem:[#allocation2 + $0x110] sm:$0x1] %v2072_v28  ;;  %295 = vst [vmem:[#allocation2 + $0x118] sm:$0x1] %v2072_v28  ;;  %v367_v54 = vrot.slane %v325_v52, 7  ;;  %v449_v52 = vsub.s32 1, %v2198_v29 }
  0x3f   : > { %296 = vst [vmem:[#allocation2 + $0x120] sm:$0xff] %v2072_v28  ;;  %297 = vst [vmem:[#allocation2 + $0x128] sm:$0xff] %v2072_v28  ;;  %v326_v55 = vld [vmem:[%s2201_s8 + $0x60] sm:$0x7f]  ;;  %v327_v56 = vld [vmem:[%s2201_s8 + $0x68] sm:$0x7f] }
  0x40   : > { %298 = vst [vmem:[#allocation2 + $0x130] sm:$0xff] %v2072_v28  ;;  %299 = vst [vmem:[#allocation2 + $0x138] sm:$0x1] %v2072_v28  ;;  %v368_v57 = vrot.slane %v326_v55, 7  ;;  %v369_v58 = vrot.slane %v327_v56, 7 }
  0x41   : > { %300 = vst [vmem:[#allocation2 + $0x140] sm:$0x1] %v2072_v28  ;;  %301 = vst [vmem:[#allocation2 + $0x148] sm:$0x1] %v2072_v28  ;;  %v328_v59 = vld [vmem:[%s2201_s8 + $0x70] sm:$0x7f] }
  0x42   : > { %302 = vst [vmem:[#allocation2 + $0x150] sm:$0xff] %v2072_v28  ;;  %303 = vst [vmem:[#allocation2 + $0x158] sm:$0xff] %v2072_v28  ;;  %v329_v60 = vld [vmem:[%s2201_s8 + $0x78] sm:$0x7f]  ;;  %v370_v61 = vrot.slane %v328_v59, 7 }
  0x43   : > { %304 = vst [vmem:[#allocation2 + $0x160] sm:$0xff] %v2072_v28  ;;  %305 = vst [vmem:[#allocation2 + $0x168] sm:$0x1] %v2072_v28  ;;  %v371_v62 = vrot.slane %v329_v60, 7  ;;  %v330_v63 = vld [vmem:[%s2201_s8 + $0x80] sm:$0x7f] }
  0x44   : > { %306 = vst [vmem:[#allocation2 + $0x170] sm:$0x1] %v2072_v28  ;;  %307 = vst [vmem:[#allocation2 + $0x178] sm:$0x1] %v2072_v28  ;;  %v331_v0 = vld [vmem:[%s2201_s8 + $0x88] sm:$0x7f] }
  0x45   : > { %308 = vst [vmem:[#allocation2 + $0x180] sm:$0xff] %v2072_v28  ;;  %309 = vst [vmem:[#allocation2 + $0x188] sm:$0xff] %v2072_v28  ;;  %v372_v1 = vrot.slane %v330_v63, 7  ;;  %v373_v2 = vrot.slane %v331_v0, 7  ;;  %v332_v3 = vld [vmem:[%s2201_s8 + $0x90] sm:$0x7f] }
  0x46   : > { %310 = vst [vmem:[#allocation2 + $0x190] sm:$0xff] %v2072_v28  ;;  %311 = vst [vmem:[#allocation2 + $0x198] sm:$0x1] %v2072_v28  ;;  %v333_v4 = vld [vmem:[%s2201_s8 + $0x98] sm:$0x7f]  ;;  %v374_v5 = vrot.slane %v332_v3, 7 }
  0x47   : > { %312 = vst [vmem:[#allocation2 + $0x1a0] sm:$0x1] %v2072_v28  ;;  %313 = vst [vmem:[#allocation2 + $0x1a8] sm:$0x1] %v2072_v28  ;;  %v375_v6 = vrot.slane %v333_v4, 7 }
  0x48   : > { %399 = vst [vmem:[#allocation2 + $0x30] sm:$0xfe] %v356_v33  ;;  %400 = vst [vmem:[#allocation2 + $0x38] sm:$0xfe] %v357_v34  ;;  %v334_v7 = vld [vmem:[%s2201_s8 + $0xa0] sm:$0x7f] }
  0x49   : > { %401 = vst [vmem:[#allocation2 + $0x40] sm:$0xfe] %v358_v35  ;;  %402 = vst [vmem:[#allocation2 + $0x60] sm:$0xfe] %v359_v37  ;;  %v421_v8 = vld [vmem:[#allocation2] sm:$0x7f] }
  0x4a   : > { %403 = vst [vmem:[#allocation2 + $0x68] sm:$0xfe] %v360_v41  ;;  %404 = vst [vmem:[#allocation2 + $0x70] sm:$0xfe] %v361_v42  ;;  %v376_v9 = vrot.slane %v334_v7, 7 }
  0x4b   : > { %405 = vst [vmem:[#allocation2 + $0x90] sm:$0xfe] %v362_v45  ;;  %406 = vst [vmem:[#allocation2 + $0x98] sm:$0xfe] %v363_v46  ;;  %v481_v11 = vld [vmem:[#allocation2] sm:$0xfe] }
  0x4c   : > { %407 = vst [vmem:[#allocation2 + $0xa0] sm:$0xfe] %v364_v49  ;;  %408 = vst [vmem:[#allocation2 + $0xc0] sm:$0xfe] %v365_v50  ;;  %v625_v16 = vld [vmem:[#allocation2] sm:$0xfc] }
  0x4d   : > { %409 = vst [vmem:[#allocation2 + $0xc8] sm:$0xfe] %v366_v53  ;;  %410 = vst [vmem:[#allocation2 + $0xd0] sm:$0xfe] %v367_v54  ;;  %v628_v17 = vld [vmem:[#allocation2 + $0x18] sm:$0x1] }
  0x4e   : > { %411 = vst [vmem:[#allocation2 + $0xf0] sm:$0xfe] %v368_v57  ;;  %412 = vst [vmem:[#allocation2 + $0xf8] sm:$0xfe] %v369_v58  ;;  %v1103_v32 = vld [vmem:[#allocation2 + $0x48] sm:$0x1] }
  0x4f   : > { %413 = vst [vmem:[#allocation2 + $0x100] sm:$0xfe] %v370_v61  ;;  %414 = vst [vmem:[#allocation2 + $0x120] sm:$0xfe] %v371_v62  ;;  %v875_v19 = vld [vmem:[#allocation2 + $0x30] sm:$0x7f] }
  0x50   : > { %415 = vst [vmem:[#allocation2 + $0x128] sm:$0xfe] %v372_v1  ;;  %416 = vst [vmem:[#allocation2 + $0x130] sm:$0xfe] %v373_v2  ;;  %v956_v27 = vld [vmem:[#allocation2 + $0x30] sm:$0xfe] }
  0x51   : > { %v2231_v10 = vld [vmem:[%s2228_s9] ss:$4 sm:$0x7]  ;;  %417 = vst [vmem:[#allocation2 + $0x150] sm:$0xfe] %v374_v5 }
  0x52   : > { %418 = vst [vmem:[#allocation2 + $0x158] sm:$0xfe] %v375_v6  ;;  %v2235_v12 = vrot.slane %v2231_v10, %v2210_v40  ;;  %v2238_v13 = vld [vmem:[%s2228_s9 + $0x1] ss:$4 sm:$0x7]  ;;  %v2305_v61 = vrot.slane %v2231_v10, %v449_v52 }
  0x53   : > { %v2241_v14 = vld [vmem:[%s2228_s9 + $0x2] ss:$4 sm:$0x7]  ;;  %419 = vst [vmem:[#allocation2 + $0x160] sm:$0xfe] %v376_v9  ;;  %v2245_v15 = vrot.slane %v2238_v13, %v2210_v40  ;;  %v2310_v2 = vrot.slane %v2238_v13, %v449_v52 }
  0x54   : > { %v2249_v18 = vrot.slane %v2241_v14, %v2210_v40  ;;  %v458_v20 = vmul.f32 %v2235_v12, %v421_v8  ;;  %v2253_v21 = vld [vmem:[%s2228_s9 + $0xc] ss:$4 sm:$0x7]  ;;  %v2256_v22 = vld [vmem:[%s2228_s9 + $0xd] ss:$4 sm:$0x7]  ;;  %v2313_v4 = vrot.slane %v2241_v14, %v449_v52 }
  0x55   : > { %v518_v23 = vmul.f32 %v2245_v15, %v481_v11  ;;  %v2263_v26 = vrot.slane %v2253_v21, %v2210_v40  ;;  %v2266_v28 = vld [vmem:[%s2228_s9 + $0xe] ss:$4 sm:$0x7]  ;;  %v2270_v30 = vrot.slane %v2256_v22, %v2210_v40  ;;  %v2278_v38 = vld [vmem:[%s2228_s9 + $0x18] ss:$4 sm:$0x7]  ;;  %v2318_v7 = vrot.slane %v2253_v21, %v449_v52 }
  0x56   : > { %v683_v24 = vmul.f32 %v2249_v18, %v625_v16  ;;  %v686_v25 = vmul.f32 %v2249_v18, %v628_v17  ;;  %v1100_v31 = vld [vmem:[#allocation2 + $0x30] sm:$0xfc]  ;;  %v2274_v33 = vrot.slane %v2266_v28, %v2210_v40  ;;  %v1350_v39 = vld [vmem:[#allocation2 + $0x60] sm:$0x7f]  ;;  %v2285_v44 = vrot.slane %v2278_v38, %v2210_v40  ;;  %v1578_v56 = vld [vmem:[#allocation2 + $0x78] sm:$0x1] }
  0x57   : > { %v560_v34 = vrot.slane %v518_v23, 1  ;;  %v912_v37 = vmul.f32 %v2263_v26, %v875_v19  ;;  %v993_v41 = vmul.f32 %v2270_v30, %v956_v27  ;;  %v2288_v45 = vld [vmem:[%s2228_s9 + $0x19] ss:$4 sm:$0x7]  ;;  %v422_v60 = vld [vmem:[#allocation2 + $0x8] sm:$0x7f] }
  0x58   : > { %v768_v35 = vrot.slane %v683_v24, 2  ;;  %v769_v36 = vrot.slane %v686_v25, 2  ;;  %v1158_v42 = vmul.f32 %v2274_v33, %v1100_v31  ;;  %v1161_v43 = vmul.f32 %v2274_v33, %v1103_v32  ;;  %v1431_v46 = vld [vmem:[#allocation2 + $0x60] sm:$0xfe]  ;;  %v482_v62 = vld [vmem:[#allocation2 + $0x8] sm:$0xfe] }
  0x59   : > { %v602_v47 = vadd.f32 %v560_v34, %v458_v20  ;;  %v2293_v49 = vrot.slane %v2288_v45, %v2210_v40  ;;  %v2296_v50 = vld [vmem:[%s2228_s9 + $0x1a] ss:$4 sm:$0x7]  ;;  %v1035_v53 = vrot.slane %v993_v41, 1  ;;  %v626_v63 = vld [vmem:[#allocation2 + $0x8] sm:$0xfc]  ;;  %v1387_v1 = vmul.f32 %v2285_v44, %v1350_v39 }
  0x5a   : > { %v770_v48 = vsel %vm767_vm0, %v768_v35, %v769_v36  ;;  %v1575_v51 = vld [vmem:[#allocation2 + $0x60] sm:$0xfc]  ;;  %v1242_v54 = vrot.slane %v1158_v42, 2  ;;  %v1243_v55 = vrot.slane %v1161_v43, 2  ;;  %v2302_v59 = vrot.slane %v2296_v50, %v2210_v40  ;;  %v629_v3 = vld [vmem:[#allocation2 + $0x20] sm:$0x1] }
  0x5b   : > { %v852_v57 = vadd.f32 %v770_v48, %v602_v47  ;;  %v1468_v58 = vmul.f32 %v2293_v49, %v1431_v46  ;;  %v459_v8 = vmul.f32 %v2305_v61, %v422_v60  ;;  %v519_v9 = vmul.f32 %v2310_v2, %v482_v62  ;;  %v876_v17 = vld [vmem:[#allocation2 + $0x38] sm:$0x7f]  ;;  %v1104_v36 = vld [vmem:[#allocation2 + $0x50] sm:$0x1]  ;;  %v1351_v42 = vld [vmem:[#allocation2 + $0x68] sm:$0x7f] }
  0x5c   : > { %v1244_v0 = vsel %vm767_vm0, %v1242_v54, %v1243_v55  ;;  %v1633_v40 = vmul.f32 %v2302_v59, %v1575_v51  ;;  %v1636_v6 = vmul.f32 %v2302_v59, %v1578_v56  ;;  %v684_v11 = vmul.f32 %v2313_v4, %v626_v63  ;;  %v957_v19 = vld [vmem:[#allocation2 + $0x38] sm:$0xfe]  ;;  %v1579_v60 = vld [vmem:[#allocation2 + $0x80] sm:$0x1] }
  0x5d   : > { %v933_v5 = vadd.f32 %v912_v37, %v852_v57  ;;  %v687_v16 = vmul.f32 %v2313_v4, %v629_v3  ;;  %v1510_v23 = vrot.slane %v1468_v58, 1  ;;  %v1101_v27 = vld [vmem:[#allocation2 + $0x38] sm:$0xfc]  ;;  %v561_v31 = vrot.slane %v519_v9, 1  ;;  %v1432_v57 = vld [vmem:[#allocation2 + $0x68] sm:$0xfe] }
  0x5e   : > { %v1717_v24 = vrot.slane %v1633_v40, 2  ;;  %v1718_v25 = vrot.slane %v1636_v6, 2  ;;  %v771_v32 = vrot.slane %v684_v11, 2  ;;  %v2325_v35 = vrot.slane %v2256_v22, %v449_v52  ;;  %v1576_v58 = vld [vmem:[#allocation2 + $0x68] sm:$0xfc] }
  0x5f   : > { %v1077_v20 = vadd.f32 %v1035_v53, %v933_v5  ;;  %v772_v34 = vrot.slane %v687_v16, 2  ;;  %v913_v39 = vmul.f32 %v2318_v7, %v876_v17  ;;  %v2329_v41 = vrot.slane %v2266_v28, %v449_v52  ;;  %v423_v17 = vld [vmem:[#allocation2 + $0x10] sm:$0x7f] }
  0x60   : > { %v2332_v43 = vrot.slane %v2278_v38, %v449_v52  ;;  %v603_v46 = vadd.f32 %v561_v31, %v459_v8  ;;  %v994_v48 = vmul.f32 %v2325_v35, %v957_v19  ;;  %v2337_v51 = vrot.slane %v2288_v45, %v449_v52  ;;  %v483_v19 = vld [vmem:[#allocation2 + $0x10] sm:$0xfe] }
  0x61   : > { %v1326_v37 = vadd.f32 %v1244_v0, %v1077_v20  ;;  %v773_v47 = vsel %vm767_vm0, %v771_v32, %v772_v34  ;;  %v1719_v54 = vsel %vm767_vm0, %v1717_v24, %v1718_v25  ;;  %v1159_v55 = vmul.f32 %v2329_v41, %v1101_v27  ;;  %v630_v25 = vld [vmem:[#allocation2 + $0x28] sm:$0x1] }
  0x62   : > { %v1162_v56 = vmul.f32 %v2329_v41, %v1104_v36  ;;  %v853_v62 = vadd.f32 %v773_v47, %v603_v46  ;;  %v1036_v63 = vrot.slane %v994_v48, 1  ;;  %v1388_v0 = vmul.f32 %v2332_v43, %v1351_v42  ;;  %v958_v36 = vld [vmem:[#allocation2 + $0x40] sm:$0xfe] }
  0x63   : > { %v1408_v53 = vadd.f32 %v1387_v1, %v1326_v37  ;;  %v2344_v3 = vrot.slane %v2296_v50, %v449_v52  ;;  %v1245_v40 = vrot.slane %v1159_v55, 2  ;;  %v453_v1 = vsub.s32 2, %v2198_v29  ;;  %v627_v29 = vld [vmem:[#allocation2 + $0x10] sm:$0xfc] }
  0x64   : > { %v1246_v6 = vrot.slane %v1162_v56, 2  ;;  %v934_v8 = vadd.f32 %v913_v39, %v853_v62  ;;  %v1469_v9 = vmul.f32 %v2337_v51, %v1432_v57  ;;  %v877_v39 = vld [vmem:[#allocation2 + $0x40] sm:$0x7f]  ;;  %v1352_v62 = vld [vmem:[#allocation2 + $0x70] sm:$0x7f] }
  0x65   : > { %v1552_v5 = vadd.f32 %v1510_v23, %v1408_v53  ;;  %v1634_v11 = vmul.f32 %v2344_v3, %v1576_v58  ;;  %v1637_v16 = vmul.f32 %v2344_v3, %v1579_v60  ;;  %v2352_v52 = vrot.slane %v2231_v10, %v453_v1  ;;  %v1102_v53 = vld [vmem:[#allocation2 + $0x40] sm:$0xfc] }
  0x66   : > { %v1247_v24 = vsel %vm767_vm0, %v1245_v40, %v1246_v6  ;;  %v2355_v23 = vrot.slane %v2238_v13, %v453_v1  ;;  %v1078_v27 = vadd.f32 %v1036_v63, %v934_v8  ;;  %v2358_v34 = vrot.slane %v2241_v14, %v453_v1 }
  0x67   : > { %v1801_v20 = vadd.f32 %v1719_v54, %v1552_v5  ;;  %v1720_v31 = vrot.slane %v1634_v11, 2  ;;  %v1721_v32 = vrot.slane %v1637_v16, 2  ;;  %v460_v37 = vmul.f32 %v2352_v52, %v423_v17  ;;  %v1105_v54 = vld [vmem:[#allocation2 + $0x58] sm:$0x1]  ;;  %v1577_v11 = vld [vmem:[#allocation2 + $0x70] sm:$0xfc] }
  0x68   : > { %v520_v10 = vmul.f32 %v2355_v23, %v483_v19  ;;  %v2367_v13 = vrot.slane %v2253_v21, %v453_v1  ;;  %v2370_v42 = vrot.slane %v2256_v22, %v453_v1  ;;  %v1327_v46 = vadd.f32 %v1247_v24, %v1078_v27  ;;  %v484_v16 = vld [vmem:[#allocation2 + $0x30] sm:$0xfe] }
  0x69   : > { %1822 = vst [vmem:[%s2361_s14] sm:$0x7f] %v1801_v20  ;;  %v1511_v47 = vrot.slane %v1469_v9, 1  ;;  %v685_v14 = vmul.f32 %v2358_v34, %v627_v29  ;;  %v688_v48 = vmul.f32 %v2358_v34, %v630_v25  ;;  %v1722_v55 = vsel %vm767_vm0, %v1720_v31, %v1721_v32  ;;  %v1433_v9 = vld [vmem:[#allocation2 + $0x70] sm:$0xfe]  ;;  %v1580_v20 = vld [vmem:[#allocation2 + $0x88] sm:$0x1] }
  0x6a   : > { %v562_v56 = vrot.slane %v520_v10, 1  ;;  %v995_v57 = vmul.f32 %v2370_v42, %v958_v36  ;;  %v2377_v58 = vrot.slane %v2266_v28, %v453_v1  ;;  %v1409_v21 = vadd.f32 %v1388_v0, %v1327_v46  ;;  %v631_v31 = vld [vmem:[#allocation2 + $0x30] sm:$0xfc]  ;;  %v634_v32 = vld [vmem:[#allocation2 + $0x48] sm:$0x1] }
  0x6b   : > { %v774_v60 = vrot.slane %v685_v14, 2  ;;  %v775_v22 = vrot.slane %v688_v48, 2  ;;  %v2380_v63 = vrot.slane %v2278_v38, %v453_v1  ;;  %v914_v40 = vmul.f32 %v2367_v13, %v877_v39  ;;  %v424_v38 = vld [vmem:[#allocation2 + $0x30] sm:$0x7f]  ;;  %v878_v48 = vld [vmem:[#allocation2 + $0x60] sm:$0x7f] }
  0x6c   : > { %v604_v5 = vadd.f32 %v562_v56, %v460_v37  ;;  %v1160_v6 = vmul.f32 %v2377_v58, %v1102_v53  ;;  %v1163_v8 = vmul.f32 %v2377_v58, %v1105_v54  ;;  %v1553_v17 = vadd.f32 %v1511_v47, %v1409_v21  ;;  %v959_v53 = vld [vmem:[#allocation2 + $0x60] sm:$0xfe] }
  0x6d   : > { %v776_v28 = vsel %vm767_vm0, %v774_v60, %v775_v22  ;;  %v1037_v0 = vrot.slane %v995_v57, 1  ;;  %v2387_v19 = vrot.slane %v2288_v45, %v453_v1  ;;  %v2390_v27 = vrot.slane %v2296_v50, %v453_v1  ;;  %v1106_v56 = vld [vmem:[#allocation2 + $0x60] sm:$0xfc]  ;;  %v1109_v57 = vld [vmem:[#allocation2 + $0x78] sm:$0x1] }
  0x6e   : > { %v854_v24 = vadd.f32 %v776_v28, %v604_v5  ;;  %v1248_v29 = vrot.slane %v1160_v6, 2  ;;  %v1249_v25 = vrot.slane %v1163_v8, 2  ;;  %v1802_v36 = vadd.f32 %v1722_v55, %v1553_v17  ;;  %v1434_v5 = vld [vmem:[#allocation2 + $0x90] sm:$0xfe] }
  0x6f   : > { %v1389_v37 = vmul.f32 %v2380_v63, %v1352_v62  ;;  %v1470_v10 = vmul.f32 %v2387_v19, %v1433_v9  ;;  %v521_v39 = vmul.f32 %v2245_v15, %v484_v16  ;;  %v1635_v46 = vmul.f32 %v2390_v27, %v1577_v11 }
  0x70   : > { %v935_v45 = vadd.f32 %v914_v40, %v854_v24  ;;  %v1638_v47 = vmul.f32 %v2390_v27, %v1580_v20  ;;  %v461_v14 = vmul.f32 %v2235_v12, %v424_v38  ;;  %1823 = vst [vmem:[%s2361_s14 + $0x8] sm:$0x7f] %v1802_v36  ;;  %v1250_v50 = vsel %vm767_vm0, %v1248_v29, %v1249_v25  ;;  %v1353_v20 = vld [vmem:[#allocation2 + $0x90] sm:$0x7f]  ;;  %v1584_v24 = vld [vmem:[#allocation2 + $0xa8] sm:$0x1] }
  0x71   : > { %v563_v1 = vrot.slane %v521_v39, 1  ;;  %v689_v54 = vmul.f32 %v2249_v18, %v631_v31  ;;  %v692_v55 = vmul.f32 %v2249_v18, %v634_v32  ;;  %v1512_v60 = vrot.slane %v1470_v10, 1  ;;  %v1581_v38 = vld [vmem:[#allocation2 + $0x90] sm:$0xfc]  ;;  %v425_v32 = vld [vmem:[#allocation2 + $0x38] sm:$0x7f] }
  0x72   : > { %v1079_v21 = vadd.f32 %v1037_v0, %v935_v45  ;;  %v1723_v22 = vrot.slane %v1635_v46, 2  ;;  %v1724_v62 = vrot.slane %v1638_v47, 2  ;;  %v996_v9 = vmul.f32 %v2270_v30, %v959_v53  ;;  %v485_v36 = vld [vmem:[#allocation2 + $0x38] sm:$0xfe] }
  0x73   : > { %v605_v40 = vadd.f32 %v563_v1, %v461_v14  ;;  %v777_v6 = vrot.slane %v689_v54, 2  ;;  %v778_v8 = vrot.slane %v692_v55, 2  ;;  %v915_v16 = vmul.f32 %v2263_v26, %v878_v48  ;;  %v632_v47 = vld [vmem:[#allocation2 + $0x38] sm:$0xfc]  ;;  %v635_v14 = vld [vmem:[#allocation2 + $0x50] sm:$0x1] }
  0x74   : > { %v1328_v11 = vadd.f32 %v1250_v50, %v1079_v21  ;;  %v1164_v17 = vmul.f32 %v2274_v33, %v1106_v56  ;;  %v1167_v28 = vmul.f32 %v2274_v33, %v1109_v57  ;;  %v1725_v0 = vsel %vm767_vm0, %v1723_v22, %v1724_v62  ;;  %v879_v21 = vld [vmem:[#allocation2 + $0x68] sm:$0x7f] }
  0x75   : > { %v779_v29 = vsel %vm767_vm0, %v777_v6, %v778_v8  ;;  %v1038_v25 = vrot.slane %v996_v9, 1  ;;  %v1471_v31 = vmul.f32 %v2293_v49, %v1434_v5  ;;  %v1390_v48 = vmul.f32 %v2285_v44, %v1353_v20  ;;  %v1107_v6 = vld [vmem:[#allocation2 + $0x68] sm:$0xfc]  ;;  %v1110_v8 = vld [vmem:[#allocation2 + $0x80] sm:$0x1] }
  0x76   : > { %v1410_v10 = vadd.f32 %v1389_v37, %v1328_v11  ;;  %v855_v39 = vadd.f32 %v779_v29, %v605_v40  ;;  %v1251_v45 = vrot.slane %v1164_v17, 2  ;;  %v1252_v46 = vrot.slane %v1167_v28, 2  ;;  %v960_v37 = vld [vmem:[#allocation2 + $0x68] sm:$0xfe]  ;;  %v1435_v17 = vld [vmem:[#allocation2 + $0x98] sm:$0xfe] }
  0x77   : > { %v1513_v53 = vrot.slane %v1471_v31, 1  ;;  %v1639_v50 = vmul.f32 %v2302_v59, %v1581_v38  ;;  %v1642_v1 = vmul.f32 %v2302_v59, %v1584_v24  ;;  %v462_v56 = vmul.f32 %v2305_v61, %v425_v32 }
  0x78   : > { %v1554_v54 = vadd.f32 %v1512_v60, %v1410_v10  ;;  %v936_v55 = vadd.f32 %v915_v16, %v855_v39  ;;  %v522_v57 = vmul.f32 %v2310_v2, %v485_v36  ;;  %v690_v5 = vmul.f32 %v2313_v4, %v632_v47  ;;  %v1354_v10 = vld [vmem:[#allocation2 + $0x98] sm:$0x7f] }
  0x79   : > { %v1726_v22 = vrot.slane %v1639_v50, 2  ;;  %v1727_v62 = vrot.slane %v1642_v1, 2  ;;  %v693_v40 = vmul.f32 %v2313_v4, %v635_v14  ;;  %v1253_v60 = vsel %vm767_vm0, %v1251_v45, %v1252_v46  ;;  %v426_v14 = vld [vmem:[#allocation2 + $0x40] sm:$0x7f] }
  0x7a   : > { %v1803_v9 = vadd.f32 %v1725_v0, %v1554_v54  ;;  %v1080_v11 = vadd.f32 %v1038_v25, %v936_v55  ;;  %v564_v16 = vrot.slane %v522_v57, 1  ;;  %v780_v28 = vrot.slane %v690_v5, 2  ;;  %v1582_v0 = vld [vmem:[#allocation2 + $0x98] sm:$0xfc]  ;;  %v1585_v25 = vld [vmem:[#allocation2 + $0xb0] sm:$0x1] }
  0x7b   : > { %v781_v20 = vrot.slane %v693_v40, 2  ;;  %v916_v38 = vmul.f32 %v2318_v7, %v879_v21  ;;  %v997_v24 = vmul.f32 %v2325_v35, %v960_v37  ;;  %v1165_v32 = vmul.f32 %v2329_v41, %v1107_v6  ;;  %v486_v50 = vld [vmem:[#allocation2 + $0x40] sm:$0xfe]  ;;  %v636_v21 = vld [vmem:[#allocation2 + $0x58] sm:$0x1] }
  0x7c   : > { %1824 = vst [vmem:[%s2361_s14 + $0x10] sm:$0x7f] %v1803_v9  ;;  %v1329_v29 = vadd.f32 %v1253_v60, %v1080_v11  ;;  %v606_v31 = vadd.f32 %v564_v16, %v462_v56  ;;  %v1168_v36 = vmul.f32 %v2329_v41, %v1110_v8  ;;  %v1728_v39 = vsel %vm767_vm0, %v1726_v22, %v1727_v62  ;;  %v633_v57 = vld [vmem:[#allocation2 + $0x40] sm:$0xfc]  ;;  %v880_v11 = vld [vmem:[#allocation2 + $0x70] sm:$0x7f] }
  0x7d   : > { %v782_v45 = vsel %vm767_vm0, %v780_v28, %v781_v20  ;;  %v1039_v46 = vrot.slane %v997_v24, 1  ;;  %v1472_v47 = vmul.f32 %v2337_v51, %v1435_v17  ;;  %v1254_v55 = vrot.slane %v1165_v32, 2  ;;  %v1108_v20 = vld [vmem:[#allocation2 + $0x70] sm:$0xfc]  ;;  %v1111_v24 = vld [vmem:[#allocation2 + $0x88] sm:$0x1] }
  0x7e   : > { %v1411_v1 = vadd.f32 %v1390_v48, %v1329_v29  ;;  %v856_v54 = vadd.f32 %v782_v45, %v606_v31  ;;  %v1255_v56 = vrot.slane %v1168_v36, 2  ;;  %v1391_v37 = vmul.f32 %v2332_v43, %v1354_v10  ;;  %v961_v48 = vld [vmem:[#allocation2 + $0x70] sm:$0xfe]  ;;  %v1436_v32 = vld [vmem:[#allocation2 + $0xa0] sm:$0xfe] }
  0x7f   : > { %v1514_v5 = vrot.slane %v1472_v47, 1  ;;  %v1640_v40 = vmul.f32 %v2344_v3, %v1582_v0  ;;  %v1643_v22 = vmul.f32 %v2344_v3, %v1585_v25  ;;  %v463_v8 = vmul.f32 %v2352_v52, %v426_v14 }
  0x80   : > { %v1555_v62 = vadd.f32 %v1513_v53, %v1411_v1  ;;  %v937_v6 = vadd.f32 %v916_v38, %v856_v54  ;;  %v523_v9 = vmul.f32 %v2355_v23, %v486_v50  ;;  %v691_v17 = vmul.f32 %v2358_v34, %v633_v57  ;;  %v1355_v1 = vld [vmem:[#allocation2 + $0xa0] sm:$0x7f] }
  0x81   : > { %v1729_v60 = vrot.slane %v1640_v40, 2  ;;  %v1730_v16 = vrot.slane %v1643_v22, 2  ;;  %v694_v28 = vmul.f32 %v2358_v34, %v636_v21  ;;  %v1256_v53 = vsel %vm767_vm0, %v1254_v55, %v1255_v56  ;;  %v427_v21 = vld [vmem:[#allocation2 + $0x60] sm:$0x7f] }
  0x82   : > { %v1804_v29 = vadd.f32 %v1728_v39, %v1555_v62  ;;  %v1081_v31 = vadd.f32 %v1039_v46, %v937_v6  ;;  %v565_v38 = vrot.slane %v523_v9, 1  ;;  %v783_v36 = vrot.slane %v691_v17, 2  ;;  %v1583_v39 = vld [vmem:[#allocation2 + $0xa0] sm:$0xfc]  ;;  %v1586_v46 = vld [vmem:[#allocation2 + $0xb8] sm:$0x1] }
  0x83   : > { %v784_v10 = vrot.slane %v694_v28, 2  ;;  %v917_v0 = vmul.f32 %v2367_v13, %v880_v11  ;;  %v998_v25 = vmul.f32 %v2370_v42, %v961_v48  ;;  %v1166_v14 = vmul.f32 %v2377_v58, %v1108_v20  ;;  %v487_v40 = vld [vmem:[#allocation2 + $0x60] sm:$0xfe]  ;;  %v640_v11 = vld [vmem:[#allocation2 + $0x78] sm:$0x1] }
  0x84   : > { %1825 = vst [vmem:[%s2361_s14 + $0x18] sm:$0x7f] %v1804_v29  ;;  %v1330_v45 = vadd.f32 %v1256_v53, %v1081_v31  ;;  %v607_v47 = vadd.f32 %v565_v38, %v463_v8  ;;  %v1169_v50 = vmul.f32 %v2377_v58, %v1111_v24  ;;  %v1731_v54 = vsel %vm767_vm0, %v1729_v60, %v1730_v16  ;;  %v637_v9 = vld [vmem:[#allocation2 + $0x60] sm:$0xfc]  ;;  %v881_v31 = vld [vmem:[#allocation2 + $0x90] sm:$0x7f] }
  0x85   : > { %v785_v55 = vsel %vm767_vm0, %v783_v36, %v784_v10  ;;  %v1040_v56 = vrot.slane %v998_v25, 1  ;;  %v1473_v57 = vmul.f32 %v2387_v19, %v1436_v32  ;;  %v1257_v6 = vrot.slane %v1166_v14, 2  ;;  %v1112_v10 = vld [vmem:[#allocation2 + $0x90] sm:$0xfc]  ;;  %v1115_v25 = vld [vmem:[#allocation2 + $0xa8] sm:$0x1] }
  0x86   : > { %v1412_v22 = vadd.f32 %v1391_v37, %v1330_v45  ;;  %v857_v62 = vadd.f32 %v785_v55, %v607_v47  ;;  %v1258_v8 = vrot.slane %v1169_v50, 2  ;;  %v1392_v48 = vmul.f32 %v2380_v63, %v1355_v1  ;;  %v962_v37 = vld [vmem:[#allocation2 + $0x90] sm:$0xfe]  ;;  %v1437_v14 = vld [vmem:[#allocation2 + $0xc0] sm:$0xfe] }
  0x87   : > { %v1515_v17 = vrot.slane %v1473_v57, 1  ;;  %v1641_v28 = vmul.f32 %v2390_v27, %v1583_v39  ;;  %v1644_v60 = vmul.f32 %v2390_v27, %v1586_v46  ;;  %v464_v24 = vmul.f32 %v2235_v12, %v427_v21 }
  0x88   : > { %v1556_v16 = vadd.f32 %v1514_v5, %v1412_v22  ;;  %v938_v20 = vadd.f32 %v917_v0, %v857_v62  ;;  %v524_v29 = vmul.f32 %v2245_v15, %v487_v40  ;;  %v695_v32 = vmul.f32 %v2249_v18, %v637_v9  ;;  %v1356_v22 = vld [vmem:[#allocation2 + $0xc0] sm:$0x7f] }
  0x89   : > { %v1732_v53 = vrot.slane %v1641_v28, 2  ;;  %v1733_v38 = vrot.slane %v1644_v60, 2  ;;  %v698_v36 = vmul.f32 %v2249_v18, %v640_v11  ;;  %v1259_v5 = vsel %vm767_vm0, %v1257_v6, %v1258_v8  ;;  %v428_v11 = vld [vmem:[#allocation2 + $0x68] sm:$0x7f] }
  0x8a   : > { %v1805_v45 = vadd.f32 %v1731_v54, %v1556_v16  ;;  %v1082_v47 = vadd.f32 %v1040_v56, %v938_v20  ;;  %v566_v0 = vrot.slane %v524_v29, 1  ;;  %v786_v50 = vrot.slane %v695_v32, 2  ;;  %v1587_v54 = vld [vmem:[#allocation2 + $0xc0] sm:$0xfc]  ;;  %v1590_v56 = vld [vmem:[#allocation2 + $0xd8] sm:$0x1] }
  0x8b   : > { %v787_v1 = vrot.slane %v698_v36, 2  ;;  %v918_v39 = vmul.f32 %v2263_v26, %v881_v31  ;;  %v999_v46 = vmul.f32 %v2270_v30, %v962_v37  ;;  %v1170_v21 = vmul.f32 %v2274_v33, %v1112_v10  ;;  %v488_v28 = vld [vmem:[#allocation2 + $0x68] sm:$0xfe]  ;;  %v641_v31 = vld [vmem:[#allocation2 + $0x80] sm:$0x1] }
  0x8c   : > { %1826 = vst [vmem:[%s2361_s14 + $0x20] sm:$0x7f] %v1805_v45  ;;  %v1331_v55 = vadd.f32 %v1259_v5, %v1082_v47  ;;  %v608_v57 = vadd.f32 %v566_v0, %v464_v24  ;;  %v1173_v40 = vmul.f32 %v2274_v33, %v1115_v25  ;;  %v1734_v62 = vsel %vm767_vm0, %v1732_v53, %v1733_v38  ;;  %v638_v29 = vld [vmem:[#allocation2 + $0x68] sm:$0xfc]  ;;  %v882_v47 = vld [vmem:[#allocation2 + $0x98] sm:$0x7f] }
  0x8d   : > { %v788_v6 = vsel %vm767_vm0, %v786_v50, %v787_v1  ;;  %v1041_v8 = vrot.slane %v999_v46, 1  ;;  %v1474_v9 = vmul.f32 %v2293_v49, %v1437_v14  ;;  %v1260_v20 = vrot.slane %v1170_v21, 2  ;;  %v1113_v1 = vld [vmem:[#allocation2 + $0x98] sm:$0xfc]  ;;  %v1116_v46 = vld [vmem:[#allocation2 + $0xb0] sm:$0x1] }
  0x8e   : > { %v1413_v60 = vadd.f32 %v1392_v48, %v1331_v55  ;;  %v858_v16 = vadd.f32 %v788_v6, %v608_v57  ;;  %v1261_v24 = vrot.slane %v1173_v40, 2  ;;  %v1393_v37 = vmul.f32 %v2285_v44, %v1356_v22  ;;  %v963_v48 = vld [vmem:[#allocation2 + $0x98] sm:$0xfe]  ;;  %v1438_v21 = vld [vmem:[#allocation2 + $0xc8] sm:$0xfe] }
  0x8f   : > { %v1516_v32 = vrot.slane %v1474_v9, 1  ;;  %v1645_v36 = vmul.f32 %v2302_v59, %v1587_v54  ;;  %v1648_v53 = vmul.f32 %v2302_v59, %v1590_v56  ;;  %v465_v25 = vmul.f32 %v2305_v61, %v428_v11 }
  0x90   : > { %v1557_v38 = vadd.f32 %v1515_v17, %v1413_v60  ;;  %v939_v10 = vadd.f32 %v918_v39, %v858_v16  ;;  %v525_v45 = vmul.f32 %v2310_v2, %v488_v28  ;;  %v696_v14 = vmul.f32 %v2313_v4, %v638_v29  ;;  %v1357_v60 = vld [vmem:[#allocation2 + $0xc8] sm:$0x7f] }
  0x91   : > { %v1735_v5 = vrot.slane %v1645_v36, 2  ;;  %v1736_v0 = vrot.slane %v1648_v53, 2  ;;  %v699_v50 = vmul.f32 %v2313_v4, %v641_v31  ;;  %v1262_v17 = vsel %vm767_vm0, %v1260_v20, %v1261_v24  ;;  %v429_v31 = vld [vmem:[#allocation2 + $0x70] sm:$0x7f] }
  0x92   : > { %v1806_v55 = vadd.f32 %v1734_v62, %v1557_v38  ;;  %v1083_v57 = vadd.f32 %v1041_v8, %v939_v10  ;;  %v567_v39 = vrot.slane %v525_v45, 1  ;;  %v789_v40 = vrot.slane %v696_v14, 2  ;;  %v1588_v62 = vld [vmem:[#allocation2 + $0xc8] sm:$0xfc]  ;;  %v1591_v8 = vld [vmem:[#allocation2 + $0xe0] sm:$0x1] }
  0x93   : > { %v790_v22 = vrot.slane %v699_v50, 2  ;;  %v919_v54 = vmul.f32 %v2318_v7, %v882_v47  ;;  %v1000_v56 = vmul.f32 %v2325_v35, %v963_v48  ;;  %v1171_v11 = vmul.f32 %v2329_v41, %v1113_v1  ;;  %v489_v36 = vld [vmem:[#allocation2 + $0x70] sm:$0xfe]  ;;  %v642_v47 = vld [vmem:[#allocation2 + $0x88] sm:$0x1] }
  0x94   : > { %1827 = vst [vmem:[%s2361_s14 + $0x28] sm:$0x7f] %v1806_v55  ;;  %v1332_v6 = vadd.f32 %v1262_v17, %v1083_v57  ;;  %v609_v9 = vadd.f32 %v567_v39, %v465_v25  ;;  %v1174_v28 = vmul.f32 %v2329_v41, %v1116_v46  ;;  %v1737_v16 = vsel %vm767_vm0, %v1735_v5, %v1736_v0  ;;  %v639_v45 = vld [vmem:[#allocation2 + $0x70] sm:$0xfc]  ;;  %v883_v57 = vld [vmem:[#allocation2 + $0xa0] sm:$0x7f] }
  0x95   : > { %v791_v20 = vsel %vm767_vm0, %v789_v40, %v790_v22  ;;  %v1042_v24 = vrot.slane %v1000_v56, 1  ;;  %v1475_v29 = vmul.f32 %v2337_v51, %v1438_v21  ;;  %v1263_v10 = vrot.slane %v1171_v11, 2  ;;  %v1114_v22 = vld [vmem:[#allocation2 + $0xa0] sm:$0xfc]  ;;  %v1117_v56 = vld [vmem:[#allocation2 + $0xb8] sm:$0x1] }
  0x96   : > { %v1414_v53 = vadd.f32 %v1393_v37, %v1332_v6  ;;  %v859_v38 = vadd.f32 %v791_v20, %v609_v9  ;;  %v1264_v25 = vrot.slane %v1174_v28, 2  ;;  %v1394_v48 = vmul.f32 %v2332_v43, %v1357_v60  ;;  %v964_v37 = vld [vmem:[#allocation2 + $0xa0] sm:$0xfe]  ;;  %v1439_v11 = vld [vmem:[#allocation2 + $0xd0] sm:$0xfe] }
  0x97   : > { %v1517_v14 = vrot.slane %v1475_v29, 1  ;;  %v1646_v50 = vmul.f32 %v2344_v3, %v1588_v62  ;;  %v1649_v5 = vmul.f32 %v2344_v3, %v1591_v8  ;;  %v466_v46 = vmul.f32 %v2352_v52, %v429_v31 }
  0x98   : > { %v1558_v0 = vadd.f32 %v1516_v32, %v1414_v53  ;;  %v940_v1 = vadd.f32 %v919_v54, %v859_v38  ;;  %v526_v55 = vmul.f32 %v2355_v23, %v489_v36  ;;  %v697_v21 = vmul.f32 %v2358_v34, %v639_v45  ;;  %v1358_v53 = vld [vmem:[#allocation2 + $0xd0] sm:$0x7f] }
  0x99   : > { %v1738_v17 = vrot.slane %v1646_v50, 2  ;;  %v1739_v39 = vrot.slane %v1649_v5, 2  ;;  %v700_v40 = vmul.f32 %v2358_v34, %v642_v47  ;;  %v1265_v32 = vsel %vm767_vm0, %v1263_v10, %v1264_v25  ;;  %v430_v47 = vld [vmem:[#allocation2 + $0x90] sm:$0x7f] }
  0x9a   : > { %v1807_v6 = vadd.f32 %v1737_v16, %v1558_v0  ;;  %v1084_v9 = vadd.f32 %v1042_v24, %v940_v1  ;;  %v568_v54 = vrot.slane %v526_v55, 1  ;;  %v792_v28 = vrot.slane %v697_v21, 2  ;;  %v1589_v16 = vld [vmem:[#allocation2 + $0xd0] sm:$0xfc]  ;;  %v1592_v24 = vld [vmem:[#allocation2 + $0xe8] sm:$0x1] }
  0x9b   : > { %v793_v60 = vrot.slane %v700_v40, 2  ;;  %v920_v62 = vmul.f32 %v2367_v13, %v883_v57  ;;  %v1001_v8 = vmul.f32 %v2370_v42, %v964_v37  ;;  %v1172_v31 = vmul.f32 %v2377_v58, %v1114_v22  ;;  %v490_v50 = vld [vmem:[#allocation2 + $0x90] sm:$0xfe]  ;;  %v646_v57 = vld [vmem:[#allocation2 + $0xa8] sm:$0x1] }
  0x9c   : > { %1828 = vst [vmem:[%s2361_s14 + $0x30] sm:$0x7f] %v1807_v6  ;;  %v1333_v20 = vadd.f32 %v1265_v32, %v1084_v9  ;;  %v610_v29 = vadd.f32 %v568_v54, %v466_v46  ;;  %v1175_v36 = vmul.f32 %v2377_v58, %v1117_v56  ;;  %v1740_v38 = vsel %vm767_vm0, %v1738_v17, %v1739_v39  ;;  %v643_v55 = vld [vmem:[#allocation2 + $0x90] sm:$0xfc]  ;;  %v884_v9 = vld [vmem:[#allocation2 + $0xc0] sm:$0x7f] }
  0x9d   : > { %v794_v10 = vsel %vm767_vm0, %v792_v28, %v793_v60  ;;  %v1043_v25 = vrot.slane %v1001_v8, 1  ;;  %v1476_v45 = vmul.f32 %v2387_v19, %v1439_v11  ;;  %v1266_v1 = vrot.slane %v1172_v31, 2  ;;  %v1118_v60 = vld [vmem:[#allocation2 + $0xc0] sm:$0xfc]  ;;  %v1121_v8 = vld [vmem:[#allocation2 + $0xd8] sm:$0x1] }
  0x9e   : > { %v1415_v5 = vadd.f32 %v1394_v48, %v1333_v20  ;;  %v860_v0 = vadd.f32 %v794_v10, %v610_v29  ;;  %v1267_v46 = vrot.slane %v1175_v36, 2  ;;  %v1395_v37 = vmul.f32 %v2380_v63, %v1358_v53  ;;  %v965_v48 = vld [vmem:[#allocation2 + $0xc0] sm:$0xfe]  ;;  %v1440_v31 = vld [vmem:[#allocation2 + $0xf0] sm:$0xfe] }
  0x9f   : > { %v1518_v21 = vrot.slane %v1476_v45, 1  ;;  %v1647_v40 = vmul.f32 %v2390_v27, %v1589_v16  ;;  %v1650_v17 = vmul.f32 %v2390_v27, %v1592_v24  ;;  %v467_v56 = vmul.f32 %v2235_v12, %v430_v47 }
  0xa0   : > { %v1559_v39 = vadd.f32 %v1517_v14, %v1415_v5  ;;  %v941_v22 = vadd.f32 %v920_v62, %v860_v0  ;;  %v527_v6 = vmul.f32 %v2245_v15, %v490_v50  ;;  %v701_v11 = vmul.f32 %v2249_v18, %v643_v55  ;;  %v1359_v5 = vld [vmem:[#allocation2 + $0xf0] sm:$0x7f] }
  0xa1   : > { %v1741_v32 = vrot.slane %v1647_v40, 2  ;;  %v1742_v54 = vrot.slane %v1650_v17, 2  ;;  %v704_v28 = vmul.f32 %v2249_v18, %v646_v57  ;;  %v1268_v14 = vsel %vm767_vm0, %v1266_v1, %v1267_v46  ;;  %v431_v57 = vld [vmem:[#allocation2 + $0x98] sm:$0x7f] }
  0xa2   : > { %v1808_v20 = vadd.f32 %v1740_v38, %v1559_v39  ;;  %v1085_v29 = vadd.f32 %v1043_v25, %v941_v22  ;;  %v569_v62 = vrot.slane %v527_v6, 1  ;;  %v795_v36 = vrot.slane %v701_v11, 2  ;;  %v1593_v38 = vld [vmem:[#allocation2 + $0xf0] sm:$0xfc]  ;;  %v1596_v25 = vld [vmem:[#allocation2 + $0x108] sm:$0x1] }
  0xa3   : > { %v796_v53 = vrot.slane %v704_v28, 2  ;;  %v921_v16 = vmul.f32 %v2263_v26, %v884_v9  ;;  %v1002_v24 = vmul.f32 %v2270_v30, %v965_v48  ;;  %v1176_v47 = vmul.f32 %v2274_v33, %v1118_v60  ;;  %v491_v40 = vld [vmem:[#allocation2 + $0x98] sm:$0xfe]  ;;  %v647_v9 = vld [vmem:[#allocation2 + $0xb0] sm:$0x1] }
  0xa4   : > { %1829 = vst [vmem:[%s2361_s14 + $0x38] sm:$0x7f] %v1808_v20  ;;  %v1334_v10 = vadd.f32 %v1268_v14, %v1085_v29  ;;  %v611_v45 = vadd.f32 %v569_v62, %v467_v56  ;;  %v1179_v50 = vmul.f32 %v2274_v33, %v1121_v8  ;;  %v1743_v0 = vsel %vm767_vm0, %v1741_v32, %v1742_v54  ;;  %v644_v6 = vld [vmem:[#allocation2 + $0x98] sm:$0xfc]  ;;  %v885_v29 = vld [vmem:[#allocation2 + $0xc8] sm:$0x7f] }
  0xa5   : > { %v797_v1 = vsel %vm767_vm0, %v795_v36, %v796_v53  ;;  %v1044_v46 = vrot.slane %v1002_v24, 1  ;;  %v1477_v55 = vmul.f32 %v2293_v49, %v1440_v31  ;;  %v1269_v22 = vrot.slane %v1176_v47, 2  ;;  %v1119_v53 = vld [vmem:[#allocation2 + $0xc8] sm:$0xfc]  ;;  %v1122_v24 = vld [vmem:[#allocation2 + $0xe0] sm:$0x1] }
  0xa6   : > { %v1416_v17 = vadd.f32 %v1395_v37, %v1334_v10  ;;  %v861_v39 = vadd.f32 %v797_v1, %v611_v45  ;;  %v1270_v56 = vrot.slane %v1179_v50, 2  ;;  %v1396_v48 = vmul.f32 %v2285_v44, %v1359_v5  ;;  %v966_v37 = vld [vmem:[#allocation2 + $0xc8] sm:$0xfe]  ;;  %v1441_v47 = vld [vmem:[#allocation2 + $0xf8] sm:$0xfe] }
  0xa7   : > { %v1519_v11 = vrot.slane %v1477_v55, 1  ;;  %v1651_v28 = vmul.f32 %v2302_v59, %v1593_v38  ;;  %v1654_v32 = vmul.f32 %v2302_v59, %v1596_v25  ;;  %v468_v8 = vmul.f32 %v2305_v61, %v431_v57 }
  0xa8   : > { %v1560_v54 = vadd.f32 %v1518_v21, %v1416_v17  ;;  %v942_v60 = vadd.f32 %v921_v16, %v861_v39  ;;  %v528_v20 = vmul.f32 %v2310_v2, %v491_v40  ;;  %v702_v31 = vmul.f32 %v2313_v4, %v644_v6  ;;  %v1360_v17 = vld [vmem:[#allocation2 + $0xf8] sm:$0x7f] }
  0xa9   : > { %v1744_v14 = vrot.slane %v1651_v28, 2  ;;  %v1745_v62 = vrot.slane %v1654_v32, 2  ;;  %v705_v36 = vmul.f32 %v2313_v4, %v647_v9  ;;  %v1271_v21 = vsel %vm767_vm0, %v1269_v22, %v1270_v56  ;;  %v432_v9 = vld [vmem:[#allocation2 + $0xa0] sm:$0x7f] }
  0xaa   : > { %v1809_v10 = vadd.f32 %v1743_v0, %v1560_v54  ;;  %v1086_v45 = vadd.f32 %v1044_v46, %v942_v60  ;;  %v570_v16 = vrot.slane %v528_v20, 1  ;;  %v798_v50 = vrot.slane %v702_v31, 2  ;;  %v1594_v0 = vld [vmem:[#allocation2 + $0xf8] sm:$0xfc]  ;;  %v1597_v46 = vld [vmem:[#allocation2 + $0x110] sm:$0x1] }
  0xab   : > { %v799_v5 = vrot.slane %v705_v36, 2  ;;  %v922_v38 = vmul.f32 %v2318_v7, %v885_v29  ;;  %v1003_v25 = vmul.f32 %v2325_v35, %v966_v37  ;;  %v1177_v57 = vmul.f32 %v2329_v41, %v1119_v53  ;;  %v492_v28 = vld [vmem:[#allocation2 + $0xa0] sm:$0xfe]  ;;  %v648_v29 = vld [vmem:[#allocation2 + $0xb8] sm:$0x1] }
  0xac   : > { %1830 = vst [vmem:[%s2361_s14 + $0x40] sm:$0x7f] %v1809_v10  ;;  %v1335_v1 = vadd.f32 %v1271_v21, %v1086_v45  ;;  %v612_v55 = vadd.f32 %v570_v16, %v468_v8  ;;  %v1180_v40 = vmul.f32 %v2329_v41, %v1122_v24  ;;  %v1746_v39 = vsel %vm767_vm0, %v1744_v14, %v1745_v62  ;;  %v645_v20 = vld [vmem:[#allocation2 + $0xa0] sm:$0xfc]  ;;  %v886_v45 = vld [vmem:[#allocation2 + $0xd0] sm:$0x7f] }
  0xad   : > { %v800_v22 = vsel %vm767_vm0, %v798_v50, %v799_v5  ;;  %v1045_v56 = vrot.slane %v1003_v25, 1  ;;  %v1478_v6 = vmul.f32 %v2337_v51, %v1441_v47  ;;  %v1272_v60 = vrot.slane %v1177_v57, 2  ;;  %v1120_v5 = vld [vmem:[#allocation2 + $0xd0] sm:$0xfc]  ;;  %v1123_v25 = vld [vmem:[#allocation2 + $0xe8] sm:$0x1] }
  0xae   : > { %v1417_v32 = vadd.f32 %v1396_v48, %v1335_v1  ;;  %v862_v54 = vadd.f32 %v800_v22, %v612_v55  ;;  %v1273_v8 = vrot.slane %v1180_v40, 2  ;;  %v1397_v37 = vmul.f32 %v2332_v43, %v1360_v17  ;;  %v967_v48 = vld [vmem:[#allocation2 + $0xd0] sm:$0xfe]  ;;  %v1442_v57 = vld [vmem:[#allocation2 + $0x100] sm:$0xfe] }
  0xaf   : > { %v1520_v31 = vrot.slane %v1478_v6, 1  ;;  %v1652_v36 = vmul.f32 %v2344_v3, %v1594_v0  ;;  %v1655_v14 = vmul.f32 %v2344_v3, %v1597_v46  ;;  %v469_v24 = vmul.f32 %v2352_v52, %v432_v9 }
  0xb0   : > { %v1561_v62 = vadd.f32 %v1519_v11, %v1417_v32  ;;  %v943_v53 = vadd.f32 %v922_v38, %v862_v54  ;;  %v529_v10 = vmul.f32 %v2355_v23, %v492_v28  ;;  %v703_v47 = vmul.f32 %v2358_v34, %v645_v20  ;;  %v1361_v32 = vld [vmem:[#allocation2 + $0x100] sm:$0x7f] }
  0xb1   : > { %v1747_v21 = vrot.slane %v1652_v36, 2  ;;  %v1748_v16 = vrot.slane %v1655_v14, 2  ;;  %v706_v50 = vmul.f32 %v2358_v34, %v648_v29  ;;  %v1274_v11 = vsel %vm767_vm0, %v1272_v60, %v1273_v8  ;;  %v433_v29 = vld [vmem:[#allocation2 + $0xc0] sm:$0x7f] }
  0xb2   : > { %v1810_v1 = vadd.f32 %v1746_v39, %v1561_v62  ;;  %v1087_v55 = vadd.f32 %v1045_v56, %v943_v53  ;;  %v571_v38 = vrot.slane %v529_v10, 1  ;;  %v801_v40 = vrot.slane %v703_v47, 2  ;;  %v1595_v39 = vld [vmem:[#allocation2 + $0x100] sm:$0xfc]  ;;  %v1598_v56 = vld [vmem:[#allocation2 + $0x118] sm:$0x1] }
  0xb3   : > { %v802_v17 = vrot.slane %v706_v50, 2  ;;  %v923_v0 = vmul.f32 %v2367_v13, %v886_v45  ;;  %v1004_v46 = vmul.f32 %v2370_v42, %v967_v48  ;;  %v1178_v9 = vmul.f32 %v2377_v58, %v1120_v5  ;;  %v493_v36 = vld [vmem:[#allocation2 + $0xc0] sm:$0xfe]  ;;  %v652_v45 = vld [vmem:[#allocation2 + $0xd8] sm:$0x1] }
  0xb4   : > { %1831 = vst [vmem:[%s2361_s14 + $0x48] sm:$0x7f] %v1810_v1  ;;  %v1336_v22 = vadd.f32 %v1274_v11, %v1087_v55  ;;  %v613_v6 = vadd.f32 %v571_v38, %v469_v24  ;;  %v1181_v28 = vmul.f32 %v2377_v58, %v1123_v25  ;;  %v1749_v54 = vsel %vm767_vm0, %v1747_v21, %v1748_v16  ;;  %v649_v10 = vld [vmem:[#allocation2 + $0xc0] sm:$0xfc]  ;;  %v887_v55 = vld [vmem:[#allocation2 + $0xf0] sm:$0x7f] }
  0xb5   : > { %v803_v60 = vsel %vm767_vm0, %v801_v40, %v802_v17  ;;  %v1046_v8 = vrot.slane %v1004_v46, 1  ;;  %v1479_v20 = vmul.f32 %v2387_v19, %v1442_v57  ;;  %v1275_v53 = vrot.slane %v1178_v9, 2  ;;  %v1124_v17 = vld [vmem:[#allocation2 + $0xf0] sm:$0xfc]  ;;  %v1127_v46 = vld [vmem:[#allocation2 + $0x108] sm:$0x1] }
  0xb6   : > { %v1418_v14 = vadd.f32 %v1397_v37, %v1336_v22  ;;  %v863_v62 = vadd.f32 %v803_v60, %v613_v6  ;;  %v1276_v24 = vrot.slane %v1181_v28, 2  ;;  %v1398_v48 = vmul.f32 %v2380_v63, %v1361_v32  ;;  %v968_v37 = vld [vmem:[#allocation2 + $0xf0] sm:$0xfe]  ;;  %v1443_v9 = vld [vmem:[#allocation2 + $0x120] sm:$0xfe] }
  0xb7   : > { %v1521_v47 = vrot.slane %v1479_v20, 1  ;;  %v1653_v50 = vmul.f32 %v2390_v27, %v1595_v39  ;;  %v1656_v21 = vmul.f32 %v2390_v27, %v1598_v56  ;;  %v470_v25 = vmul.f32 %v2235_v12, %v433_v29 }
  0xb8   : > { %v1562_v16 = vadd.f32 %v1520_v31, %v1418_v14  ;;  %v944_v5 = vadd.f32 %v923_v0, %v863_v62  ;;  %v530_v1 = vmul.f32 %v2245_v15, %v493_v36  ;;  %v707_v57 = vmul.f32 %v2249_v18, %v649_v10  ;;  %v1362_v14 = vld [vmem:[#allocation2 + $0x120] sm:$0x7f] }
  0xb9   : > { %v1750_v11 = vrot.slane %v1653_v50, 2  ;;  %v1751_v38 = vrot.slane %v1656_v21, 2  ;;  %v710_v40 = vmul.f32 %v2249_v18, %v652_v45  ;;  %v1277_v31 = vsel %vm767_vm0, %v1275_v53, %v1276_v24  ;;  %v434_v45 = vld [vmem:[#allocation2 + $0xc8] sm:$0x7f] }
  0xba   : > { %v1811_v22 = vadd.f32 %v1749_v54, %v1562_v16  ;;  %v1088_v6 = vadd.f32 %v1046_v8, %v944_v5  ;;  %v572_v0 = vrot.slane %v530_v1, 1  ;;  %v804_v28 = vrot.slane %v707_v57, 2  ;;  %v1599_v54 = vld [vmem:[#allocation2 + $0x120] sm:$0xfc]  ;;  %v1602_v8 = vld [vmem:[#allocation2 + $0x138] sm:$0x1] }
  0xbb   : > { %v805_v32 = vrot.slane %v710_v40, 2  ;;  %v924_v39 = vmul.f32 %v2263_v26, %v887_v55  ;;  %v1005_v56 = vmul.f32 %v2270_v30, %v968_v37  ;;  %v1182_v29 = vmul.f32 %v2274_v33, %v1124_v17  ;;  %v494_v50 = vld [vmem:[#allocation2 + $0xc8] sm:$0xfe]  ;;  %v653_v55 = vld [vmem:[#allocation2 + $0xe0] sm:$0x1] }
  0xbc   : > { %1832 = vst [vmem:[%s2361_s14 + $0x50] sm:$0x7f] %v1811_v22  ;;  %v1337_v60 = vadd.f32 %v1277_v31, %v1088_v6  ;;  %v614_v20 = vadd.f32 %v572_v0, %v470_v25  ;;  %v1185_v36 = vmul.f32 %v2274_v33, %v1127_v46  ;;  %v1752_v62 = vsel %vm767_vm0, %v1750_v11, %v1751_v38  ;;  %v650_v1 = vld [vmem:[#allocation2 + $0xc8] sm:$0xfc]  ;;  %v888_v6 = vld [vmem:[#allocation2 + $0xf8] sm:$0x7f] }
  0xbd   : > { %v806_v53 = vsel %vm767_vm0, %v804_v28, %v805_v32  ;;  %v1047_v24 = vrot.slane %v1005_v56, 1  ;;  %v1480_v10 = vmul.f32 %v2293_v49, %v1443_v9  ;;  %v1278_v5 = vrot.slane %v1182_v29, 2  ;;  %v1125_v32 = vld [vmem:[#allocation2 + $0xf8] sm:$0xfc]  ;;  %v1128_v56 = vld [vmem:[#allocation2 + $0x110] sm:$0x1] }
  0xbe   : > { %v1419_v21 = vadd.f32 %v1398_v48, %v1337_v60  ;;  %v864_v16 = vadd.f32 %v806_v53, %v614_v20  ;;  %v1279_v25 = vrot.slane %v1185_v36, 2  ;;  %v1399_v37 = vmul.f32 %v2285_v44, %v1362_v14  ;;  %v969_v48 = vld [vmem:[#allocation2 + $0xf8] sm:$0xfe]  ;;  %v1444_v29 = vld [vmem:[#allocation2 + $0x128] sm:$0xfe] }
  0xbf   : > { %v1522_v57 = vrot.slane %v1480_v10, 1  ;;  %v1657_v40 = vmul.f32 %v2302_v59, %v1599_v54  ;;  %v1660_v11 = vmul.f32 %v2302_v59, %v1602_v8  ;;  %v471_v46 = vmul.f32 %v2305_v61, %v434_v45 }
  0xc0   : > { %v1563_v38 = vadd.f32 %v1521_v47, %v1419_v21  ;;  %v945_v17 = vadd.f32 %v924_v39, %v864_v16  ;;  %v531_v22 = vmul.f32 %v2310_v2, %v494_v50  ;;  %v708_v9 = vmul.f32 %v2313_v4, %v650_v1  ;;  %v1363_v21 = vld [vmem:[#allocation2 + $0x128] sm:$0x7f] }
  0xc1   : > { %v1753_v31 = vrot.slane %v1657_v40, 2  ;;  %v1754_v0 = vrot.slane %v1660_v11, 2  ;;  %v711_v28 = vmul.f32 %v2313_v4, %v653_v55  ;;  %v1280_v47 = vsel %vm767_vm0, %v1278_v5, %v1279_v25  ;;  %v435_v55 = vld [vmem:[#allocation2 + $0xd0] sm:$0x7f] }
  0xc2   : > { %v1812_v60 = vadd.f32 %v1752_v62, %v1563_v38  ;;  %v1089_v20 = vadd.f32 %v1047_v24, %v945_v17  ;;  %v573_v39 = vrot.slane %v531_v22, 1  ;;  %v807_v36 = vrot.slane %v708_v9, 2  ;;  %v1600_v62 = vld [vmem:[#allocation2 + $0x128] sm:$0xfc]  ;;  %v1603_v24 = vld [vmem:[#allocation2 + $0x140] sm:$0x1] }
  0xc3   : > { %v808_v14 = vrot.slane %v711_v28, 2  ;;  %v925_v54 = vmul.f32 %v2318_v7, %v888_v6  ;;  %v1006_v8 = vmul.f32 %v2325_v35, %v969_v48  ;;  %v1183_v45 = vmul.f32 %v2329_v41, %v1125_v32  ;;  %v495_v40 = vld [vmem:[#allocation2 + $0xd0] sm:$0xfe]  ;;  %v654_v6 = vld [vmem:[#allocation2 + $0xe8] sm:$0x1] }
  0xc4   : > { %1833 = vst [vmem:[%s2361_s14 + $0x58] sm:$0x7f] %v1812_v60  ;;  %v1338_v53 = vadd.f32 %v1280_v47, %v1089_v20  ;;  %v615_v10 = vadd.f32 %v573_v39, %v471_v46  ;;  %v1186_v50 = vmul.f32 %v2329_v41, %v1128_v56  ;;  %v1755_v16 = vsel %vm767_vm0, %v1753_v31, %v1754_v0  ;;  %v651_v22 = vld [vmem:[#allocation2 + $0xd0] sm:$0xfc]  ;;  %v889_v20 = vld [vmem:[#allocation2 + $0x100] sm:$0x7f] }
  0xc5   : > { %v809_v5 = vsel %vm767_vm0, %v807_v36, %v808_v14  ;;  %v1048_v25 = vrot.slane %v1006_v8, 1  ;;  %v1481_v1 = vmul.f32 %v2337_v51, %v1444_v29  ;;  %v1281_v17 = vrot.slane %v1183_v45, 2  ;;  %v1126_v14 = vld [vmem:[#allocation2 + $0x100] sm:$0xfc]  ;;  %v1129_v8 = vld [vmem:[#allocation2 + $0x118] sm:$0x1] }
  0xc6   : > { %v1420_v11 = vadd.f32 %v1399_v37, %v1338_v53  ;;  %v865_v38 = vadd.f32 %v809_v5, %v615_v10  ;;  %v1282_v46 = vrot.slane %v1186_v50, 2  ;;  %v1400_v48 = vmul.f32 %v2332_v43, %v1363_v21  ;;  %v970_v37 = vld [vmem:[#allocation2 + $0x100] sm:$0xfe]  ;;  %v1445_v45 = vld [vmem:[#allocation2 + $0x130] sm:$0xfe] }
  0xc7   : > { %v1523_v9 = vrot.slane %v1481_v1, 1  ;;  %v1658_v28 = vmul.f32 %v2344_v3, %v1600_v62  ;;  %v1661_v31 = vmul.f32 %v2344_v3, %v1603_v24  ;;  %v472_v56 = vmul.f32 %v2352_v52, %v435_v55 }
  0xc8   : > { %v1564_v0 = vadd.f32 %v1522_v57, %v1420_v11  ;;  %v946_v32 = vadd.f32 %v925_v54, %v865_v38  ;;  %v532_v60 = vmul.f32 %v2355_v23, %v495_v40  ;;  %v709_v29 = vmul.f32 %v2358_v34, %v651_v22  ;;  %v1364_v11 = vld [vmem:[#allocation2 + $0x130] sm:$0x7f] }
  0xc9   : > { %v1756_v47 = vrot.slane %v1658_v28, 2  ;;  %v1757_v39 = vrot.slane %v1661_v31, 2  ;;  %v712_v36 = vmul.f32 %v2358_v34, %v654_v6  ;;  %v1283_v57 = vsel %vm767_vm0, %v1281_v17, %v1282_v46  ;;  %v436_v6 = vld [vmem:[#allocation2 + $0xf0] sm:$0x7f] }
  0xca   : > { %v1813_v53 = vadd.f32 %v1755_v16, %v1564_v0  ;;  %v1090_v10 = vadd.f32 %v1048_v25, %v946_v32  ;;  %v574_v54 = vrot.slane %v532_v60, 1  ;;  %v810_v50 = vrot.slane %v709_v29, 2  ;;  %v1601_v16 = vld [vmem:[#allocation2 + $0x130] sm:$0xfc]  ;;  %v1604_v25 = vld [vmem:[#allocation2 + $0x148] sm:$0x1] }
  0xcb   : > { %v811_v21 = vrot.slane %v712_v36, 2  ;;  %v926_v62 = vmul.f32 %v2367_v13, %v889_v20  ;;  %v1007_v24 = vmul.f32 %v2370_v42, %v970_v37  ;;  %v1184_v55 = vmul.f32 %v2377_v58, %v1126_v14  ;;  %v496_v28 = vld [vmem:[#allocation2 + $0xf0] sm:$0xfe]  ;;  %v658_v20 = vld [vmem:[#allocation2 + $0x108] sm:$0x1] }
  0xcc   : > { %1834 = vst [vmem:[%s2361_s14 + $0x60] sm:$0x7f] %v1813_v53  ;;  %v1339_v5 = vadd.f32 %v1283_v57, %v1090_v10  ;;  %v616_v1 = vadd.f32 %v574_v54, %v472_v56  ;;  %v1187_v40 = vmul.f32 %v2377_v58, %v1129_v8  ;;  %v1758_v38 = vsel %vm767_vm0, %v1756_v47, %v1757_v39  ;;  %v655_v60 = vld [vmem:[#allocation2 + $0xf0] sm:$0xfc]  ;;  %v890_v10 = vld [vmem:[#allocation2 + $0x120] sm:$0x7f] }
  0xcd   : > { %v812_v17 = vsel %vm767_vm0, %v810_v50, %v811_v21  ;;  %v1049_v46 = vrot.slane %v1007_v24, 1  ;;  %v1482_v22 = vmul.f32 %v2387_v19, %v1445_v45  ;;  %v1284_v32 = vrot.slane %v1184_v55, 2  ;;  %v1130_v21 = vld [vmem:[#allocation2 + $0x120] sm:$0xfc]  ;;  %v1133_v24 = vld [vmem:[#allocation2 + $0x138] sm:$0x1] }
  0xce   : > { %v1421_v31 = vadd.f32 %v1400_v48, %v1339_v5  ;;  %v866_v0 = vadd.f32 %v812_v17, %v616_v1  ;;  %v1285_v56 = vrot.slane %v1187_v40, 2  ;;  %v1401_v37 = vmul.f32 %v2380_v63, %v1364_v11  ;;  %v971_v48 = vld [vmem:[#allocation2 + $0x120] sm:$0xfe]  ;;  %v1446_v55 = vld [vmem:[#allocation2 + $0x150] sm:$0xfe] }
  0xcf   : > { %v1524_v29 = vrot.slane %v1482_v22, 1  ;;  %v1659_v36 = vmul.f32 %v2390_v27, %v1601_v16  ;;  %v1662_v47 = vmul.f32 %v2390_v27, %v1604_v25  ;;  %v473_v8 = vmul.f32 %v2235_v12, %v436_v6 }
  0xd0   : > { %v1565_v39 = vadd.f32 %v1523_v9, %v1421_v31  ;;  %v947_v14 = vadd.f32 %v926_v62, %v866_v0  ;;  %v533_v53 = vmul.f32 %v2245_v15, %v496_v28  ;;  %v713_v45 = vmul.f32 %v2249_v18, %v655_v60  ;;  %v1365_v31 = vld [vmem:[#allocation2 + $0x150] sm:$0x7f] }
  0xd1   : > { %v1759_v57 = vrot.slane %v1659_v36, 2  ;;  %v1760_v54 = vrot.slane %v1662_v47, 2  ;;  %v716_v50 = vmul.f32 %v2249_v18, %v658_v20  ;;  %v1286_v9 = vsel %vm767_vm0, %v1284_v32, %v1285_v56  ;;  %v437_v20 = vld [vmem:[#allocation2 + $0xf8] sm:$0x7f] }
  0xd2   : > { %v1814_v5 = vadd.f32 %v1758_v38, %v1565_v39  ;;  %v1091_v1 = vadd.f32 %v1049_v46, %v947_v14  ;;  %v575_v62 = vrot.slane %v533_v53, 1  ;;  %v813_v40 = vrot.slane %v713_v45, 2  ;;  %v1605_v38 = vld [vmem:[#allocation2 + $0x150] sm:$0xfc]  ;;  %v1608_v46 = vld [vmem:[#allocation2 + $0x168] sm:$0x1] }
  0xd3   : > { %v814_v11 = vrot.slane %v716_v50, 2  ;;  %v927_v16 = vmul.f32 %v2263_v26, %v890_v10  ;;  %v1008_v25 = vmul.f32 %v2270_v30, %v971_v48  ;;  %v1188_v6 = vmul.f32 %v2274_v33, %v1130_v21  ;;  %v497_v36 = vld [vmem:[#allocation2 + $0xf8] sm:$0xfe]  ;;  %v659_v10 = vld [vmem:[#allocation2 + $0x110] sm:$0x1] }
  0xd4   : > { %1835 = vst [vmem:[%s2361_s14 + $0x68] sm:$0x7f] %v1814_v5  ;;  %v1340_v17 = vadd.f32 %v1286_v9, %v1091_v1  ;;  %v617_v22 = vadd.f32 %v575_v62, %v473_v8  ;;  %v1191_v28 = vmul.f32 %v2274_v33, %v1133_v24  ;;  %v1761_v0 = vsel %vm767_vm0, %v1759_v57, %v1760_v54  ;;  %v656_v53 = vld [vmem:[#allocation2 + $0xf8] sm:$0xfc]  ;;  %v891_v1 = vld [vmem:[#allocation2 + $0x128] sm:$0x7f] }
  0xd5   : > { %v815_v32 = vsel %vm767_vm0, %v813_v40, %v814_v11  ;;  %v1050_v56 = vrot.slane %v1008_v25, 1  ;;  %v1483_v60 = vmul.f32 %v2293_v49, %v1446_v55  ;;  %v1287_v14 = vrot.slane %v1188_v6, 2  ;;  %v1131_v11 = vld [vmem:[#allocation2 + $0x128] sm:$0xfc]  ;;  %v1134_v25 = vld [vmem:[#allocation2 + $0x140] sm:$0x1] }
  0xd6   : > { %v1422_v47 = vadd.f32 %v1401_v37, %v1340_v17  ;;  %v867_v39 = vadd.f32 %v815_v32, %v617_v22  ;;  %v1288_v8 = vrot.slane %v1191_v28, 2  ;;  %v1402_v48 = vmul.f32 %v2285_v44, %v1365_v31  ;;  %v972_v37 = vld [vmem:[#allocation2 + $0x128] sm:$0xfe]  ;;  %v1447_v6 = vld [vmem:[#allocation2 + $0x158] sm:$0xfe] }
  0xd7   : > { %v1525_v45 = vrot.slane %v1483_v60, 1  ;;  %v1663_v50 = vmul.f32 %v2302_v59, %v1605_v38  ;;  %v1666_v57 = vmul.f32 %v2302_v59, %v1608_v46  ;;  %v474_v24 = vmul.f32 %v2305_v61, %v437_v20 }
  0xd8   : > { %v1566_v54 = vadd.f32 %v1524_v29, %v1422_v47  ;;  %v948_v21 = vadd.f32 %v927_v16, %v867_v39  ;;  %v534_v5 = vmul.f32 %v2310_v2, %v497_v36  ;;  %v714_v55 = vmul.f32 %v2313_v4, %v656_v53  ;;  %v1366_v47 = vld [vmem:[#allocation2 + $0x158] sm:$0x7f] }
  0xd9   : > { %v1762_v9 = vrot.slane %v1663_v50, 2  ;;  %v1763_v62 = vrot.slane %v1666_v57, 2  ;;  %v717_v40 = vmul.f32 %v2313_v4, %v659_v10  ;;  %v1289_v29 = vsel %vm767_vm0, %v1287_v14, %v1288_v8  ;;  %v438_v10 = vld [vmem:[#allocation2 + $0x100] sm:$0x7f] }
  0xda   : > { %v1815_v17 = vadd.f32 %v1761_v0, %v1566_v54  ;;  %v1092_v22 = vadd.f32 %v1050_v56, %v948_v21  ;;  %v576_v16 = vrot.slane %v534_v5, 1  ;;  %v816_v28 = vrot.slane %v714_v55, 2  ;;  %v1606_v0 = vld [vmem:[#allocation2 + $0x158] sm:$0xfc]  ;;  %v1609_v56 = vld [vmem:[#allocation2 + $0x170] sm:$0x1] }
  0xdb   : > { %v817_v31 = vrot.slane %v717_v40, 2  ;;  %v928_v38 = vmul.f32 %v2318_v7, %v891_v1  ;;  %v1009_v46 = vmul.f32 %v2325_v35, %v972_v37  ;;  %v1189_v20 = vmul.f32 %v2329_v41, %v1131_v11  ;;  %v498_v50 = vld [vmem:[#allocation2 + $0x100] sm:$0xfe]  ;;  %v660_v1 = vld [vmem:[#allocation2 + $0x118] sm:$0x1] }
  0xdc   : > { %1836 = vst [vmem:[%s2361_s14 + $0x70] sm:$0x7f] %v1815_v17  ;;  %v1341_v32 = vadd.f32 %v1289_v29, %v1092_v22  ;;  %v618_v60 = vadd.f32 %v576_v16, %v474_v24  ;;  %v1192_v36 = vmul.f32 %v2329_v41, %v1134_v25  ;;  %v1764_v39 = vsel %vm767_vm0, %v1762_v9, %v1763_v62  ;;  %v657_v5 = vld [vmem:[#allocation2 + $0x100] sm:$0xfc]  ;;  %v892_v22 = vld [vmem:[#allocation2 + $0x130] sm:$0x7f] }
  0xdd   : > { %v818_v14 = vsel %vm767_vm0, %v816_v28, %v817_v31  ;;  %v1051_v8 = vrot.slane %v1009_v46, 1  ;;  %v1484_v53 = vmul.f32 %v2337_v51, %v1447_v6  ;;  %v1290_v21 = vrot.slane %v1189_v20, 2  ;;  %v1132_v31 = vld [vmem:[#allocation2 + $0x130] sm:$0xfc]  ;;  %v1135_v46 = vld [vmem:[#allocation2 + $0x148] sm:$0x1] }
  0xde   : > { %v1423_v57 = vadd.f32 %v1402_v48, %v1341_v32  ;;  %v868_v54 = vadd.f32 %v818_v14, %v618_v60  ;;  %v1291_v24 = vrot.slane %v1192_v36, 2  ;;  %v1403_v37 = vmul.f32 %v2332_v43, %v1366_v47  ;;  %v973_v48 = vld [vmem:[#allocation2 + $0x130] sm:$0xfe]  ;;  %v1448_v20 = vld [vmem:[#allocation2 + $0x160] sm:$0xfe] }
  0xdf   : > { %v1526_v55 = vrot.slane %v1484_v53, 1  ;;  %v1664_v40 = vmul.f32 %v2344_v3, %v1606_v0  ;;  %v1667_v9 = vmul.f32 %v2344_v3, %v1609_v56  ;;  %v475_v25 = vmul.f32 %v2352_v52, %v438_v10 }
  0xe0   : > { %v1567_v62 = vadd.f32 %v1525_v45, %v1423_v57  ;;  %v949_v11 = vadd.f32 %v928_v38, %v868_v54  ;;  %v535_v17 = vmul.f32 %v2355_v23, %v498_v50  ;;  %v715_v6 = vmul.f32 %v2358_v34, %v657_v5  ;;  %v1367_v57 = vld [vmem:[#allocation2 + $0x160] sm:$0x7f] }
  0xe1   : > { %v1765_v29 = vrot.slane %v1664_v40, 2  ;;  %v1766_v16 = vrot.slane %v1667_v9, 2  ;;  %v718_v28 = vmul.f32 %v2358_v34, %v660_v1  ;;  %v1292_v45 = vsel %vm767_vm0, %v1290_v21, %v1291_v24  ;;  %v439_v1 = vld [vmem:[#allocation2 + $0x120] sm:$0x7f] }
  0xe2   : > { %v1816_v32 = vadd.f32 %v1764_v39, %v1567_v62  ;;  %v1093_v60 = vadd.f32 %v1051_v8, %v949_v11  ;;  %v577_v38 = vrot.slane %v535_v17, 1  ;;  %v819_v36 = vrot.slane %v715_v6, 2  ;;  %v1607_v39 = vld [vmem:[#allocation2 + $0x160] sm:$0xfc]  ;;  %v1610_v8 = vld [vmem:[#allocation2 + $0x178] sm:$0x1] }
  0xe3   : > { %v820_v47 = vrot.slane %v718_v28, 2  ;;  %v929_v0 = vmul.f32 %v2367_v13, %v892_v22  ;;  %v1010_v56 = vmul.f32 %v2370_v42, %v973_v48  ;;  %v1190_v10 = vmul.f32 %v2377_v58, %v1132_v31  ;;  %v499_v40 = vld [vmem:[#allocation2 + $0x120] sm:$0xfe]  ;;  %v664_v22 = vld [vmem:[#allocation2 + $0x138] sm:$0x1] }
  0xe4   : > { %1837 = vst [vmem:[%s2361_s14 + $0x78] sm:$0x7f] %v1816_v32  ;;  %v1342_v14 = vadd.f32 %v1292_v45, %v1093_v60  ;;  %v619_v53 = vadd.f32 %v577_v38, %v475_v25  ;;  %v1193_v50 = vmul.f32 %v2377_v58, %v1135_v46  ;;  %v1767_v54 = vsel %vm767_vm0, %v1765_v29, %v1766_v16  ;;  %v661_v17 = vld [vmem:[#allocation2 + $0x120] sm:$0xfc]  ;;  %v893_v60 = vld [vmem:[#allocation2 + $0x150] sm:$0x7f] }
  0xe5   : > { %v821_v21 = vsel %vm767_vm0, %v819_v36, %v820_v47  ;;  %v1052_v24 = vrot.slane %v1010_v56, 1  ;;  %v1485_v5 = vmul.f32 %v2387_v19, %v1448_v20  ;;  %v1293_v11 = vrot.slane %v1190_v10, 2  ;;  %v1136_v47 = vld [vmem:[#allocation2 + $0x150] sm:$0xfc]  ;;  %v1139_v56 = vld [vmem:[#allocation2 + $0x168] sm:$0x1] }
  0xe6   : > { %v1424_v9 = vadd.f32 %v1403_v37, %v1342_v14  ;;  %v869_v62 = vadd.f32 %v821_v21, %v619_v53  ;;  %v1294_v25 = vrot.slane %v1193_v50, 2  ;;  %v1404_v48 = vmul.f32 %v2380_v63, %v1367_v57  ;;  %v974_v37 = vld [vmem:[#allocation2 + $0x150] sm:$0xfe]  ;;  %v1449_v10 = vld [vmem:[#allocation2 + $0x180] sm:$0xfe] }
  0xe7   : > { %v1527_v6 = vrot.slane %v1485_v5, 1  ;;  %v1665_v28 = vmul.f32 %v2390_v27, %v1607_v39  ;;  %v1668_v29 = vmul.f32 %v2390_v27, %v1610_v8  ;;  %v476_v46 = vmul.f32 %v2235_v12, %v439_v1  ;;  %v1368_v5 = vld [vmem:[#allocation2 + $0x180] sm:$0x7f] }
  0xe8   : > { %v1568_v16 = vadd.f32 %v1526_v55, %v1424_v9  ;;  %v950_v31 = vadd.f32 %v929_v0, %v869_v62  ;;  %v536_v32 = vmul.f32 %v2245_v15, %v499_v40  ;;  %v719_v20 = vmul.f32 %v2249_v18, %v661_v17 }
  0xe9   : > { %v1768_v45 = vrot.slane %v1665_v28, 2  ;;  %v1769_v38 = vrot.slane %v1668_v29, 2  ;;  %v722_v36 = vmul.f32 %v2249_v18, %v664_v22  ;;  %v1295_v55 = vsel %vm767_vm0, %v1293_v11, %v1294_v25  ;;  %v662_v22 = vld [vmem:[#allocation2 + $0x128] sm:$0xfc]  ;;  %v665_v28 = vld [vmem:[#allocation2 + $0x140] sm:$0x1] }
  0xea   : > { %v1817_v14 = vadd.f32 %v1767_v54, %v1568_v16  ;;  %v1094_v53 = vadd.f32 %v1052_v24, %v950_v31  ;;  %v578_v0 = vrot.slane %v536_v32, 1  ;;  %v822_v12 = vrot.slane %v719_v20, 2  ;;  %v1611_v54 = vld [vmem:[#allocation2 + $0x180] sm:$0xfc]  ;;  %v1614_v24 = vld [vmem:[#allocation2 + $0x198] sm:$0x1] }
  0xeb   : > { %v823_v50 = vrot.slane %v722_v36, 2  ;;  %v930_v15 = vmul.f32 %v2263_v26, %v893_v60  ;;  %v1011_v57 = vmul.f32 %v2270_v30, %v974_v37  ;;  %v1194_v21 = vmul.f32 %v2274_v33, %v1136_v47  ;;  %v500_v26 = vld [vmem:[#allocation2 + $0x128] sm:$0xfe]  ;;  %v1137_v47 = vld [vmem:[#allocation2 + $0x158] sm:$0xfc] }
  0xec   : > { %1838 = vst [vmem:[%s2361_s14 + $0x80] sm:$0x7f] %v1817_v14  ;;  %v1343_v39 = vadd.f32 %v1295_v55, %v1094_v53  ;;  %v620_v8 = vadd.f32 %v578_v0, %v476_v46  ;;  %v1197_v18 = vmul.f32 %v2274_v33, %v1139_v56  ;;  %v1770_v1 = vsel %vm767_vm0, %v1768_v45, %v1769_v38  ;;  %v440_v46 = vld [vmem:[#allocation2 + $0x128] sm:$0x7f]  ;;  %v975_v45 = vld [vmem:[#allocation2 + $0x158] sm:$0xfe] }
  0xed   : > { %v824_v40 = vsel %vm767_vm0, %v822_v12, %v823_v50  ;;  %v1053_v9 = vrot.slane %v1011_v57, 1  ;;  %v1486_v62 = vmul.f32 %v2293_v49, %v1449_v10  ;;  %v1296_v25 = vrot.slane %v1194_v21, 2  ;;  %v1140_v56 = vld [vmem:[#allocation2 + $0x170] sm:$0x1]  ;;  %v1450_v55 = vld [vmem:[#allocation2 + $0x188] sm:$0xfe] }
  0xee   : > { %v1425_v11 = vadd.f32 %v1404_v48, %v1343_v39  ;;  %v870_v30 = vadd.f32 %v824_v40, %v620_v8  ;;  %v1297_v17 = vrot.slane %v1197_v18, 2  ;;  %v1405_v29 = vmul.f32 %v2285_v44, %v1368_v5  ;;  %v894_v48 = vld [vmem:[#allocation2 + $0x158] sm:$0x7f]  ;;  %v1369_v39 = vld [vmem:[#allocation2 + $0x188] sm:$0x7f] }
  0xef   : > { %v1528_v33 = vrot.slane %v1486_v62, 1  ;;  %v1669_v16 = vmul.f32 %v2302_v59, %v1611_v54  ;;  %v1672_v31 = vmul.f32 %v2302_v59, %v1614_v24  ;;  %v537_v49 = vmul.f32 %v2310_v2, %v500_v26  ;;  %v1612_v8 = vld [vmem:[#allocation2 + $0x188] sm:$0xfc]  ;;  %v1615_v21 = vld [vmem:[#allocation2 + $0x1a0] sm:$0x1] }
  0xf0   : > { %v1569_v32 = vadd.f32 %v1527_v6, %v1425_v11  ;;  %v951_v60 = vadd.f32 %v930_v15, %v870_v30  ;;  %v1298_v37 = vsel %vm767_vm0, %v1296_v25, %v1297_v17  ;;  %v720_v36 = vmul.f32 %v2313_v4, %v662_v22  ;;  %v501_v24 = vld [vmem:[#allocation2 + $0x130] sm:$0xfe]  ;;  %v666_v26 = vld [vmem:[#allocation2 + $0x148] sm:$0x1] }
  0xf1   : > { %v1771_v38 = vrot.slane %v1669_v16, 2  ;;  %v1772_v20 = vrot.slane %v1672_v31, 2  ;;  %v723_v44 = vmul.f32 %v2313_v4, %v665_v28  ;;  %v477_v6 = vmul.f32 %v2305_v61, %v440_v46  ;;  %v663_v62 = vld [vmem:[#allocation2 + $0x130] sm:$0xfc]  ;;  %v895_v16 = vld [vmem:[#allocation2 + $0x160] sm:$0x7f] }
  0xf2   : > { %v1818_v14 = vadd.f32 %v1770_v1, %v1569_v32  ;;  %v1095_v59 = vadd.f32 %v1053_v9, %v951_v60  ;;  %v579_v53 = vrot.slane %v537_v49, 1  ;;  %v825_v0 = vrot.slane %v720_v36, 2  ;;  %v1138_v60 = vld [vmem:[#allocation2 + $0x160] sm:$0xfc] }
  0xf3   : > { %v826_v10 = vrot.slane %v723_v44, 2  ;;  %v931_v2 = vmul.f32 %v2318_v7, %v894_v48  ;;  %v1012_v12 = vmul.f32 %v2325_v35, %v975_v45  ;;  %v1195_v57 = vmul.f32 %v2329_v41, %v1137_v47  ;;  %v441_v7 = vld [vmem:[#allocation2 + $0x130] sm:$0x7f] }
  0xf4   : > { %1839 = vst [vmem:[%s2361_s14 + $0x88] sm:$0x7f] %v1818_v14  ;;  %v1344_v50 = vadd.f32 %v1298_v37, %v1095_v59  ;;  %v621_v15 = vadd.f32 %v579_v53, %v477_v6  ;;  %v1198_v4 = vmul.f32 %v2329_v41, %v1140_v56  ;;  %v1773_v61 = vsel %vm767_vm0, %v1771_v38, %v1772_v20  ;;  %v1141_v37 = vld [vmem:[#allocation2 + $0x178] sm:$0x1]  ;;  %v1616_v56 = vld [vmem:[#allocation2 + $0x1a8] sm:$0x1] }
  0xf5   : > { %v827_v18 = vsel %vm767_vm0, %v825_v0, %v826_v10  ;;  %v1054_v5 = vrot.slane %v1012_v12, 1  ;;  %v1487_v54 = vmul.f32 %v2337_v51, %v1450_v55  ;;  %v1299_v40 = vrot.slane %v1195_v57, 2  ;;  %v1451_v6 = vld [vmem:[#allocation2 + $0x190] sm:$0xfe] }
  0xf6   : > { %v1426_v35 = vadd.f32 %v1405_v29, %v1344_v50  ;;  %v871_v1 = vadd.f32 %v827_v18, %v621_v15  ;;  %v1300_v9 = vrot.slane %v1198_v4, 2  ;;  %v1406_v41 = vmul.f32 %v2332_v43, %v1369_v39  ;;  %v976_v29 = vld [vmem:[#allocation2 + $0x160] sm:$0xfe]  ;;  %v1370_v10 = vld [vmem:[#allocation2 + $0x190] sm:$0x7f] }
  0xf7   : > { %v1529_v11 = vrot.slane %v1487_v54, 1  ;;  %v1670_v30 = vmul.f32 %v2344_v3, %v1612_v8  ;;  %v1673_v25 = vmul.f32 %v2344_v3, %v1615_v21  ;;  %v478_v28 = vmul.f32 %v2352_v52, %v441_v7 }
  0xf8   : > { %v1570_v17 = vadd.f32 %v1528_v33, %v1426_v35  ;;  %v952_v22 = vadd.f32 %v931_v2, %v871_v1  ;;  %v538_v51 = vmul.f32 %v2355_v23, %v501_v24  ;;  %v1301_v31 = vsel %vm767_vm0, %v1299_v40, %v1300_v9  ;;  %v1869_v35 = vld [vmem:[%s2361_s14 + $0x10] sm:$0xff] (%p2122_p5)  ;;  %v1871_v1 = vld [vmem:[%s2361_s14 + $0x18] sm:$0xff] (%p2122_p5)  ;;  %v1873_v40 = vld [vmem:[%s2361_s14 + $0x20] sm:$0xff] (%p2122_p5) }
  0xf9   : > { %v1774_v46 = vrot.slane %v1670_v30, 2  ;;  %v721_v32 = vmul.f32 %v2358_v34, %v663_v62  ;;  %v724_v43 = vmul.f32 %v2358_v34, %v666_v26  ;;  %v1775_v33 = vrot.slane %v1673_v25, 2  ;;  %v1613_v34 = vld [vmem:[#allocation2 + $0x190] sm:$0xfc]  ;;  %v1877_v62 = vld [vmem:[%s2361_s14 + $0x30] sm:$0xff] (%p2122_p5)  ;;  %v1879_v26 = vld [vmem:[%s2361_s14 + $0x38] sm:$0xff] (%p2122_p5) }
  0xfa   : > { %v1819_v49 = vadd.f32 %v1773_v61, %v1570_v17  ;;  %v1096_v3 = vadd.f32 %v1054_v5, %v952_v22  ;;  %v580_v48 = vrot.slane %v538_v51, 1  ;;  %v932_v23 = vmul.f32 %v2367_v13, %v895_v16  ;;  %v1875_v9 = vld [vmem:[%s2361_s14 + $0x28] sm:$0xff] (%p2122_p5)  ;;  %1870 = vst [vmem:[%s2701_s18 + $0x10] sm:$0xff] (%p2122_p5), %v1869_v35  ;;  %1872 = vst [vmem:[%s2701_s18 + $0x78] sm:$0xff] (%p2122_p5), %v1871_v1  ;;  %v1885_v30 = vld [vmem:[%s2361_s14 + $0x50] sm:$0xff] (%p2122_p5) }
  0xfb   : > { %v828_v45 = vrot.slane %v721_v32, 2  ;;  %v829_v52 = vrot.slane %v724_v43, 2  ;;  %v1013_v38 = vmul.f32 %v2370_v42, %v976_v29  ;;  %v1196_v44 = vmul.f32 %v2377_v58, %v1138_v60  ;;  %1874 = vst [vmem:[%s2701_s18 + $0x80] sm:$0xff] (%p2122_p5), %v1873_v40  ;;  %1876 = vst [vmem:[%s2701_s18 + $0x88] sm:$0xff] (%p2122_p5), %v1875_v9  ;;  %v1887_v25 = vld [vmem:[%s2361_s14 + $0x58] sm:$0xff] (%p2122_p5)  ;;  %v1889_v17 = vld [vmem:[%s2361_s14 + $0x60] sm:$0xff] (%p2122_p5) }
  0xfc   : > { %1840 = vst [vmem:[%s2361_s14 + $0x90] sm:$0x7f] %v1819_v49  ;;  %v1345_v20 = vadd.f32 %v1301_v31, %v1096_v3  ;;  %v622_v36 = vadd.f32 %v580_v48, %v478_v28  ;;  %v1199_v47 = vmul.f32 %v2377_v58, %v1141_v37  ;;  %v1776_v42 = vsel %vm767_vm0, %v1774_v46, %v1775_v33  ;;  %v1891_v22 = vld [vmem:[%s2361_s14 + $0x68] sm:$0xff] (%p2122_p5)  ;;  %v1893_v28 = vld [vmem:[%s2361_s14 + $0x70] sm:$0xff] (%p2122_p5)  ;;  %v1895_v51 = vld [vmem:[%s2361_s14 + $0x78] sm:$0xff] (%p2122_p5) }
  0xfd   : > { %v830_v14 = vsel %vm767_vm0, %v828_v45, %v829_v52  ;;  %v1055_v59 = vrot.slane %v1013_v38, 1  ;;  %v1302_v0 = vrot.slane %v1196_v44, 2  ;;  %v1671_v2 = vmul.f32 %v2390_v27, %v1613_v34  ;;  %1878 = vst [vmem:[%s2701_s18 + $0xf0] sm:$0xff] (%p2122_p5), %v1877_v62  ;;  %1880 = vst [vmem:[%s2701_s18 + $0xf8] sm:$0xff] (%p2122_p5), %v1879_v26  ;;  %v1897_v16 = vld [vmem:[%s2361_s14 + $0x80] sm:$0xff] (%p2122_p5)  ;;  %v1899_v29 = vld [vmem:[%s2361_s14 + $0x88] sm:$0xff] (%p2122_p5) }
  0xfe   : > { %v1427_v53 = vadd.f32 %v1406_v41, %v1345_v20  ;;  %v872_v55 = vadd.f32 %v830_v14, %v622_v36  ;;  %v1303_v13 = vrot.slane %v1199_v47, 2  ;;  %v1674_v12 = vmul.f32 %v2390_v27, %v1616_v56  ;;  %v1881_v41 = vld [vmem:[%s2361_s14 + $0x40] sm:$0xff] (%p2122_p5)  ;;  %1886 = vst [vmem:[%s2701_s18 + $0x170] sm:$0xff] (%p2122_p5), %v1885_v30  ;;  %1888 = vst [vmem:[%s2701_s18 + $0x178] sm:$0xff] (%p2122_p5), %v1887_v25 }
  0xff   : > { %v1488_v15 = vmul.f32 %v2387_v19, %v1451_v6  ;;  %v1407_v8 = vmul.f32 %v2380_v63, %v1370_v10  ;;  %v1777_v21 = vrot.slane %v1671_v2, 2  ;;  %v1865_v63 = vld [vmem:[%s2361_s14] sm:$0xff] (%p2122_p5)  ;;  %v1867_v19 = vld [vmem:[%s2361_s14 + $0x8] sm:$0xff] (%p2122_p5)  ;;  %1882 = vst [vmem:[%s2701_s18 + $0x100] sm:$0xff] (%p2122_p5), %v1881_v41  ;;  %1890 = vst [vmem:[%s2701_s18 + $0x1e0] sm:$0xff] (%p2122_p5), %v1889_v17 }
 0x100   : > { %v1571_v50 = vadd.f32 %v1529_v11, %v1427_v53  ;;  %v953_v58 = vadd.f32 %v932_v23, %v872_v55  ;;  %v1304_v57 = vsel %vm767_vm0, %v1302_v0, %v1303_v13  ;;  %v1778_v61 = vrot.slane %v1674_v12, 2  ;;  %1866 = vst [vmem:[%s2701_s18] sm:$0xff] (%p2122_p5), %v1865_v63  ;;  %1868 = vst [vmem:[%s2701_s18 + $0x8] sm:$0xff] (%p2122_p5), %v1867_v19  ;;  %v1883_v11 = vld [vmem:[%s2361_s14 + $0x48] sm:$0xff] (%p2122_p5) }
 0x101   : > { %v1530_v5 = vrot.slane %v1488_v15, 1  ;;  %1884 = vst [vmem:[%s2701_s18 + $0x168] sm:$0xff] (%p2122_p5), %v1883_v11  ;;  %1892 = vst [vmem:[%s2701_s18 + $0x1e8] sm:$0xff] (%p2122_p5), %v1891_v22 }
 0x102   : > { %v1820_v4 = vadd.f32 %v1776_v42, %v1571_v50  ;;  %v1097_v39 = vadd.f32 %v1055_v59, %v953_v58  ;;  %v1779_v7 = vsel %vm767_vm0, %v1777_v21, %v1778_v61  ;;  %1894 = vst [vmem:[%s2701_s18 + $0x1f0] sm:$0xff] (%p2122_p5), %v1893_v28  ;;  %1896 = vst [vmem:[%s2701_s18 + $0x258] sm:$0xff] (%p2122_p5), %v1895_v51 }
 0x103   : > { %1898 = vst [vmem:[%s2701_s18 + $0x260] sm:$0xff] (%p2122_p5), %v1897_v16  ;;  %1900 = vst [vmem:[%s2701_s18 + $0x268] sm:$0xff] (%p2122_p5), %v1899_v29  ;;  %v1901_v31 = vld [vmem:[%s2361_s14 + $0x90] sm:$0xff] (%p2122_p5) }
 0x104   : > { %1841 = vst [vmem:[%s2361_s14 + $0x98] sm:$0x7f] %v1820_v4  ;;  %v1346_v18 = vadd.f32 %v1304_v57, %v1097_v39  ;;  %1902 = vst [vmem:[%s2701_s18 + $0x2d0] sm:$0xff] (%p2122_p5), %v1901_v31 }
 0x106   : > { %v1428_v54 = vadd.f32 %v1407_v8, %v1346_v18  ;;  %1849 = sbr.rel (!%p2122_p5) target bundleno = 277 (0x115), region = 81 }
 0x108   : > { %v1572_v27 = vadd.f32 %v1530_v5, %v1428_v54 }
 0x10a   : > { %v1821_v24 = vadd.f32 %v1779_v7, %v1572_v27 }
 0x10b   : > { %v1903_v46 = vld [vmem:[%s2361_s14 + $0x98] sm:$0xff] (%p2122_p5) }
 0x10c   : > { %1842 = vst [vmem:[%s2361_s14 + $0xa0] sm:$0x7f] %v1821_v24  ;;  %1904 = vst [vmem:[%s2701_s18 + $0x2d8] sm:$0xff] (%p2122_p5), %v1903_v46 }
 0x113   : > { %v1905_v32 = vld [vmem:[%s2361_s14 + $0xa0] sm:$0xff] }
 0x114   : > { %1906 = vst [vmem:[%s2701_s18 + $0x2e0] sm:$0xff] %v1905_v32 }
 0x115 PF: > { %p9_p10 = scmp.ge.s32.totalorder %s2105_s13, 7   ;;  %s2754_s9 = smov %s2066_s10 }
 0x116   : > { %s2755_s10 = smov %s2116_s16  ;;  %s2756_s11 = smov %s2105_s13 }
 0x117   :  { %11 = sbr.rel (!%p9_p10) target bundleno = 2 (0x2), region = 159 }

</bundles_post_ra>
